<compile_context>
chip_gen: v5e
topology: v5e:2x2
jax: 0.10.0
libtpu: 0.0.40
codegen_flags: <defaults>
</compile_context>

<pallas_src>
import numpy as np
import jax
import jax.numpy as jnp
from jax import lax
from jax.experimental import pallas as pl
from jax.experimental.pallas import tpu as pltpu

LANES = 128          # matmul N padding (lane-dense MXU outputs)
C1_PAD = 8           # conv1 output channels stored (6 real + 2 zero)
C2_OUT = 16          # conv2 output channels stored (all real)
VMEM_LIMIT = 48 * 1024 * 1024   # explicit scoped-VMEM cap (< 64 MiB v7x phys)


# ----------------------------------------------------------------------------
# small helpers
# ----------------------------------------------------------------------------
def _round_up(x, m):
    return (x + m - 1) // m * m


def _pad_axis(x, axis, target):
    pad = target - x.shape[axis]
    if pad <= 0:
        return x
    widths = [(0, 0)] * x.ndim
    widths[axis] = (0, pad)
    return jnp.pad(x, widths)


def _choose_m_tile(m, max_tile=1024):
    """Pick (padded M, tile M): tile % 8 == 0, and ALWAYS >= 2 grid steps.

    >= 2 steps lets dimension_semantics=("parallel",) use both v7x
    TensorCores (no-op on single-TC v5e/v6e); at large M we take
    max_tile-row steps (tile sweeps: 256 ~ 63% of HBM roofline, 1024 ~ 86%).
    """
    if m >= 2 * max_tile:
        return _round_up(m, max_tile), max_tile
    tm = _round_up(max(-(-m // 2), 8), 8)
    return 2 * tm, tm


# ----------------------------------------------------------------------------
# Pallas kernels
# ----------------------------------------------------------------------------
def _conv_pool_kernel(p_ref, w_ref, b_ref, o_ref):
    """Fused conv (as matmul) + bias + ReLU + 2x2 max-pool.

    p_ref: (4, TM, K) bf16 -- 4 im2col slabs (one per 2x2 pool position)
    w_ref: (K, 128)   bf16 -- conv weights, N zero-padded to 128 lanes
    b_ref: (1, 128)   f32
    o_ref: (TM, CO)   bf16 -- pooled rows, only the CO real(+pad8) channels
    """
    w = w_ref[...]                       # load weights once
    z0 = jnp.dot(p_ref[0], w, preferred_element_type=jnp.float32)
    z1 = jnp.dot(p_ref[1], w, preferred_element_type=jnp.float32)
    z2 = jnp.dot(p_ref[2], w, preferred_element_type=jnp.float32)
    z3 = jnp.dot(p_ref[3], w, preferred_element_type=jnp.float32)
    zmax = jnp.maximum(jnp.maximum(z0, z1), jnp.maximum(z2, z3))
    # max(relu(z_ij + b)) == relu(max(z_ij) + b): bias constant over window.
    y = jnp.maximum(zmax + b_ref[...], 0.0)
    o_ref[...] = y[:, : o_ref.shape[1]].astype(o_ref.dtype)


def _fc_head_kernel(x_ref, w1_ref, b1_ref, w2_ref, b2_ref, w3_ref, b3_ref,
                    o_ref):
    """Fused fc1+relu -> fc2+relu -> fc3. Intermediates stay in VMEM/vregs."""
    h = jnp.dot(x_ref[...], w1_ref[...], preferred_element_type=jnp.float32)
    h = jnp.maximum(h + b1_ref[...], 0.0).astype(w2_ref.dtype)
    h = jnp.dot(h, w2_ref[...], preferred_element_type=jnp.float32)
    h = jnp.maximum(h + b2_ref[...], 0.0).astype(w3_ref.dtype)
    o_ref[...] = (jnp.dot(h, w3_ref[...], preferred_element_type=jnp.float32)
                  + b3_ref[...])


# ----------------------------------------------------------------------------
# Layer wrappers
# ----------------------------------------------------------------------------
def conv_relu_pool(x_nhwc, w_kernel, b_kernel, out_ch, kh=5, max_tile=1024):
    """x: (B, H, W, C) bf16 NHWC.  Returns (B, PH, PW, out_ch) bf16 pooled."""
    B, H, W, C = x_nhwc.shape
    OH, OW = H - kh + 1, W - kh + 1
    PH, PW = OH // 2, OW // 2
    K = kh * kh * C
    M = B * PH * PW

    # Build the 4 pooling-window slabs directly with strided slices (no big
    # (B,OH,OW,K) intermediate, no 6-D transpose). Slab (di,dj), row (b,ph,pw),
    # K-index (i,j,c)  ==  x[b, 2*ph+di+i, 2*pw+dj+j, c].
    slabs = []
    for di in range(2):
        for dj in range(2):
            slab = jnp.concatenate(
                [x_nhwc[:,
                        di + i: di + i + 2 * (PH - 1) + 1: 2,
                        dj + j: dj + j + 2 * (PW - 1) + 1: 2, :]
                 for i in range(kh) for j in range(kh)],
                axis=-1)                              # (B, PH, PW, K)
            slabs.append(slab.reshape(M, K))
    p4 = jnp.stack(slabs, axis=0)                     # (4, M, K) bf16

    Mp, TM = _choose_m_tile(M, max_tile)
    p4 = _pad_axis(p4, 1, Mp)
    N = w_kernel.shape[1]

    out = pl.pallas_call(
        _conv_pool_kernel,
        grid=(Mp // TM,),
        in_specs=[
            pl.BlockSpec((4, TM, K), lambda m: (0, m, 0)),
            pl.BlockSpec((K, N), lambda m: (0, 0)),
            pl.BlockSpec((1, N), lambda m: (0, 0)),
        ],
        out_specs=pl.BlockSpec((TM, out_ch), lambda m: (m, 0)),
        out_shape=jax.ShapeDtypeStruct((Mp, out_ch), jnp.bfloat16),
        compiler_params=pltpu.CompilerParams(
            dimension_semantics=("parallel",),
            vmem_limit_bytes=VMEM_LIMIT),
    )(p4, w_kernel, b_kernel)
    return out[:M].reshape(B, PH, PW, out_ch)


def fc_head(x, kp, max_tile=1024):
    """x: (B, 400) bf16 (NHWC flatten of the 16 real conv2 channels)."""
    B, K = x.shape
    Bp, TB = _choose_m_tile(B, max_tile)
    x = _pad_axis(x, 0, Bp)
    N = kp["f3_w"].shape[1]
    out = pl.pallas_call(
        _fc_head_kernel,
        grid=(Bp // TB,),
        in_specs=[
            pl.BlockSpec((TB, K), lambda m: (m, 0)),
            pl.BlockSpec(kp["f1_w"].shape, lambda m: (0, 0)),
            pl.BlockSpec((1, N), lambda m: (0, 0)),
            pl.BlockSpec(kp["f2_w"].shape, lambda m: (0, 0)),
            pl.BlockSpec((1, N), lambda m: (0, 0)),
            pl.BlockSpec(kp["f3_w"].shape, lambda m: (0, 0)),
            pl.BlockSpec((1, N), lambda m: (0, 0)),
        ],
        out_specs=pl.BlockSpec((TB, N), lambda m: (m, 0)),
        out_shape=jax.ShapeDtypeStruct((Bp, N), jnp.float32),
        compiler_params=pltpu.CompilerParams(
            dimension_semantics=("parallel",),
            vmem_limit_bytes=VMEM_LIMIT),
    )(x, kp["f1_w"], kp["f1_b"], kp["f2_w"], kp["f2_b"],
      kp["f3_w"], kp["f3_b"])
    return out[:B]


# ----------------------------------------------------------------------------
# Parameter preparation (runs ONCE, outside jit): permute to NHWC/(K,N)
# layouts, zero-pad N to 128 lanes, pre-cast matmul weights to bf16.
# ----------------------------------------------------------------------------
def prepare_params(p, lanes=LANES):
    def conv_prep(w, b, in_pad):
        oc, ic, kh, kw = w.shape
        wk = jnp.transpose(w, (2, 3, 1, 0))            # (kh, kw, ic, oc)
        wk = _pad_axis(wk, 2, in_pad)                  # pad in-channels
        wk = wk.reshape(kh * kw * in_pad, oc)
        wk = _pad_axis(wk, 1, lanes).astype(jnp.bfloat16)   # (K, 128) bf16
        bk = _pad_axis(b, 0, lanes).reshape(1, lanes).astype(jnp.float32)
        return wk, bk

    c1_w, c1_b = conv_prep(p["conv1_w"], p["conv1_b"], in_pad=3)      # K=75
    c2_w, c2_b = conv_prep(p["conv2_w"], p["conv2_b"], in_pad=C1_PAD)  # K=200

    # fc1: PyTorch's 400 inputs are (c,h,w)-ordered; our flatten is (h,w,c=16).
    f1 = p["fc1_w"].reshape(120, 16, 5, 5).transpose(2, 3, 1, 0)  # (5,5,16,120)
    f1_w = _pad_axis(f1.reshape(400, 120), 1, lanes).astype(jnp.bfloat16)
    f1_b = _pad_axis(p["fc1_b"], 0, lanes).reshape(1, lanes)

    f2_w = _pad_axis(_pad_axis(p["fc2_w"].T, 0, lanes), 1,
                     lanes).astype(jnp.bfloat16)                  # (128, 128)
    f2_b = _pad_axis(p["fc2_b"], 0, lanes).reshape(1, lanes)
    f3_w = _pad_axis(_pad_axis(p["fc3_w"].T, 0, lanes), 1,
                     lanes).astype(jnp.bfloat16)                  # (128, 128)
    f3_b = _pad_axis(p["fc3_b"], 0, lanes).reshape(1, lanes)

    return dict(c1_w=c1_w, c1_b=c1_b, c2_w=c2_w, c2_b=c2_b,
                f1_w=f1_w, f1_b=f1_b, f2_w=f2_w, f2_b=f2_b,
                f3_w=f3_w, f3_b=f3_b)


# ----------------------------------------------------------------------------
# Forward pass (mirrors Net.forward)
# ----------------------------------------------------------------------------
@jax.jit
def net_forward(x, kp):
    x = jnp.transpose(x, (0, 2, 3, 1)).astype(jnp.bfloat16)   # NCHW -> NHWC
    x = conv_relu_pool(x, kp["c1_w"], kp["c1_b"], out_ch=C1_PAD)  # (B,14,14,8)
    x = conv_relu_pool(x, kp["c2_w"], kp["c2_b"], out_ch=C2_OUT)  # (B,5,5,16)
    x = x.reshape(x.shape[0], -1)                    # (B, 400) real channels
    return fc_head(x, kp)[:, :10]                    # (B, 10)


# ----------------------------------------------------------------------------
# Parameters (deterministic, PyTorch-default-like uniform init)
# ----------------------------------------------------------------------------
def init_params(key):
    ks = jax.random.split(key, 10)

    def u(k, shape, fan_in):
        bound = 1.0 / np.sqrt(fan_in)
        return jax.random.uniform(k, shape, jnp.float32, -bound, bound)

    return {
        "conv1_w": u(ks[0], (6, 3, 5, 5), 3 * 25),
        "conv1_b": u(ks[1], (6,), 3 * 25),
        "conv2_w": u(ks[2], (16, 6, 5, 5), 6 * 25),
        "conv2_b": u(ks[3], (16,), 6 * 25),
        "fc1_w": u(ks[4], (120, 400), 400),
        "fc1_b": u(ks[5], (120,), 400),
        "fc2_w": u(ks[6], (84, 120), 120),
        "fc2_b": u(ks[7], (84,), 120),
        "fc3_w": u(ks[8], (10, 84), 84),
        "fc3_b": u(ks[9], (10,), 84),
    }


# Pure-JAX f32 reference with exact PyTorch semantics (NCHW, NCHW flatten).
def reference_forward(x, p):
    def conv(x, w, b):
        y = lax.conv_general_dilated(
            x, w, (1, 1), "VALID",
            dimension_numbers=("NCHW", "OIHW", "NCHW"))
        return jax.nn.relu(y + b[None, :, None, None])

    def pool(x):
        return lax.reduce_window(x, -jnp.inf, lax.max,
                                 (1, 1, 2, 2), (1, 1, 2, 2), "VALID")

    x = pool(conv(x, p["conv1_w"], p["conv1_b"]))
    x = pool(conv(x, p["conv2_w"], p["conv2_b"]))
    x = x.reshape(x.shape[0], -1)
    x = jax.nn.relu(x @ p["fc1_w"].T + p["fc1_b"])
    x = jax.nn.relu(x @ p["fc2_w"].T + p["fc2_b"])
    return x @ p["fc3_w"].T + p["fc3_b"]


if __name__ == "__main__":
    key = jax.random.PRNGKey(0)
    kx, kp_key = jax.random.split(key)
    # fc1 (16*5*5 inputs) implies 32x32 spatial input, as in CIFAR.
    x = jax.random.normal(kx, (2, 3, 32, 32), dtype=jnp.float32)
    params = init_params(kp_key)
    kparams = prepare_params(params)   # one-time layout/padding/bf16 prep

    out = jax.block_until_ready(net_forward(x, kparams))

    ref = reference_forward(x, params)
    assert out.shape == (2, 10), out.shape
    # bf16 MXU operands (f32 accumulation) -> loosened tolerance vs f32 ref.
    np.testing.assert_allclose(np.asarray(out), np.asarray(ref),
                               rtol=5e-2, atol=5e-2)
    print("KERNEL_OK")
</pallas_src>

<mosaic_0001>
module attributes {stable_mosaic.version = 11 : i64} {
  func.func @_conv_pool_kernel(%arg0: i32, %arg1: memref<4x200x75xbf16, #tpu.memory_space<vmem>>, %arg2: memref<75x128xbf16, #tpu.memory_space<vmem>>, %arg3: memref<1x128xf32, #tpu.memory_space<vmem>>, %arg4: memref<200x8xbf16, #tpu.memory_space<vmem>>) attributes {dimension_semantics = [#tpu.dimension_semantics<parallel>], iteration_bounds = array<i64: 2>, scalar_prefetch = 0 : i64, scratch_operands = 0 : i64, tpu.core_type = #tpu.core_type<tc>, window_params = [{transform_indices = @transform_0, window_bounds = array<i64: 4, 200, 75>}, {pipeline_mode = #tpu.pipeline_mode<synchronous>, transform_indices = @transform_1, window_bounds = array<i64: 75, 128>}, {pipeline_mode = #tpu.pipeline_mode<synchronous>, transform_indices = @transform_2, window_bounds = array<i64: 1, 128>}, {transform_indices = @transform_3, window_bounds = array<i64: 200, 8>}]} {
    %c0 = arith.constant 0 : index
    %c0_0 = arith.constant 0 : index
    %0 = vector.load %arg2[%c0, %c0_0] : memref<75x128xbf16, #tpu.memory_space<vmem>>, vector<75x128xbf16>
    %c0_1 = arith.constant 0 : index
    %c0_2 = arith.constant 0 : index
    %c0_3 = arith.constant 0 : index
    %1 = vector.load %arg1[%c0_1, %c0_2, %c0_3] : memref<4x200x75xbf16, #tpu.memory_space<vmem>>, vector<1x200x75xbf16>
    %2 = vector.shape_cast %1 : vector<1x200x75xbf16> to vector<200x75xbf16>
    %cst = arith.constant dense<0.000000e+00> : vector<200x128xf32>
    %3 = tpu.matmul %2, %0, %cst {dimension_numbers = #tpu.dot_dimension_numbers<[1], [0], [0], [1], [0, 0, 1, 1], [], []>} : vector<200x75xbf16>, vector<75x128xbf16>, vector<200x128xf32> -> vector<200x128xf32>
    %c1 = arith.constant 1 : index
    %c0_4 = arith.constant 0 : index
    %c0_5 = arith.constant 0 : index
    %4 = vector.load %arg1[%c1, %c0_4, %c0_5] : memref<4x200x75xbf16, #tpu.memory_space<vmem>>, vector<1x200x75xbf16>
    %5 = vector.shape_cast %4 : vector<1x200x75xbf16> to vector<200x75xbf16>
    %cst_6 = arith.constant dense<0.000000e+00> : vector<200x128xf32>
    %6 = tpu.matmul %5, %0, %cst_6 {dimension_numbers = #tpu.dot_dimension_numbers<[1], [0], [0], [1], [0, 0, 1, 1], [], []>} : vector<200x75xbf16>, vector<75x128xbf16>, vector<200x128xf32> -> vector<200x128xf32>
    %c2 = arith.constant 2 : index
    %c0_7 = arith.constant 0 : index
    %c0_8 = arith.constant 0 : index
    %7 = vector.load %arg1[%c2, %c0_7, %c0_8] : memref<4x200x75xbf16, #tpu.memory_space<vmem>>, vector<1x200x75xbf16>
    %8 = vector.shape_cast %7 : vector<1x200x75xbf16> to vector<200x75xbf16>
    %cst_9 = arith.constant dense<0.000000e+00> : vector<200x128xf32>
    %9 = tpu.matmul %8, %0, %cst_9 {dimension_numbers = #tpu.dot_dimension_numbers<[1], [0], [0], [1], [0, 0, 1, 1], [], []>} : vector<200x75xbf16>, vector<75x128xbf16>, vector<200x128xf32> -> vector<200x128xf32>
    %c3 = arith.constant 3 : index
    %c0_10 = arith.constant 0 : index
    %c0_11 = arith.constant 0 : index
    %10 = vector.load %arg1[%c3, %c0_10, %c0_11] : memref<4x200x75xbf16, #tpu.memory_space<vmem>>, vector<1x200x75xbf16>
    %11 = vector.shape_cast %10 : vector<1x200x75xbf16> to vector<200x75xbf16>
    %cst_12 = arith.constant dense<0.000000e+00> : vector<200x128xf32>
    %12 = tpu.matmul %11, %0, %cst_12 {dimension_numbers = #tpu.dot_dimension_numbers<[1], [0], [0], [1], [0, 0, 1, 1], [], []>} : vector<200x75xbf16>, vector<75x128xbf16>, vector<200x128xf32> -> vector<200x128xf32>
    %13 = arith.maximumf %3, %6 : vector<200x128xf32>
    %14 = arith.maximumf %9, %12 : vector<200x128xf32>
    %15 = arith.maximumf %13, %14 : vector<200x128xf32>
    %c0_13 = arith.constant 0 : index
    %c0_14 = arith.constant 0 : index
    %16 = vector.load %arg3[%c0_13, %c0_14] : memref<1x128xf32, #tpu.memory_space<vmem>>, vector<1x128xf32>
    %17 = vector.broadcast %16 : vector<1x128xf32> to vector<200x128xf32>
    %18 = arith.addf %15, %17 : vector<200x128xf32>
    %cst_15 = arith.constant 0.000000e+00 : f32
    %19 = vector.broadcast %cst_15 : f32 to vector<200x128xf32>
    %20 = arith.maximumf %18, %19 : vector<200x128xf32>
    %21 = vector.extract_strided_slice %20 {offsets = [0, 0], sizes = [200, 8], strides = [1, 1]} : vector<200x128xf32> to vector<200x8xf32>
    %22 = arith.truncf %21 : vector<200x8xf32> to vector<200x8xbf16>
    %c0_16 = arith.constant 0 : index
    %c0_17 = arith.constant 0 : index
    %23 = vector.load %arg4[%c0_16, %c0_17] : memref<200x8xbf16, #tpu.memory_space<vmem>>, vector<200x8xbf16>
    tpu.vector_store %arg4[%c0_16, %c0_17], %22 {strides = array<i32>} : memref<200x8xbf16, #tpu.memory_space<vmem>>, vector<200x8xbf16>,
    return
  }
  func.func @transform_0(%arg0: i32) -> (i32, i32, i32) {
    %c0_i32 = arith.constant 0 : i32
    %c0_i32_0 = arith.constant 0 : i32
    %c0_i32_1 = arith.constant 0 : i32
    return %c0_i32, %arg0, %c0_i32_0 : i32, i32, i32
  }
  func.func @transform_1(%arg0: i32) -> (i32, i32) {
    %c0_i32 = arith.constant 0 : i32
    %c0_i32_0 = arith.constant 0 : i32
    %c0_i32_1 = arith.constant 0 : i32
    return %c0_i32, %c0_i32_0 : i32, i32
  }
  func.func @transform_2(%arg0: i32) -> (i32, i32) {
    %c0_i32 = arith.constant 0 : i32
    %c0_i32_0 = arith.constant 0 : i32
    %c0_i32_1 = arith.constant 0 : i32
    return %c0_i32, %c0_i32_0 : i32, i32
  }
  func.func @transform_3(%arg0: i32) -> (i32, i32) {
    %c0_i32 = arith.constant 0 : i32
    %c0_i32_0 = arith.constant 0 : i32
    return %arg0, %c0_i32 : i32, i32
  }
}

module attributes {stable_mosaic.version = 11 : i64} {
  func.func @_conv_pool_kernel(%arg0: i32, %arg1: memref<4x32x200xbf16, #tpu.memory_space<vmem>>, %arg2: memref<200x128xbf16, #tpu.memory_space<vmem>>, %arg3: memref<1x128xf32, #tpu.memory_space<vmem>>, %arg4: memref<32x16xbf16, #tpu.memory_space<vmem>>) attributes {dimension_semantics = [#tpu.dimension_semantics<parallel>], iteration_bounds = array<i64: 2>, scalar_prefetch = 0 : i64, scratch_operands = 0 : i64, tpu.core_type = #tpu.core_type<tc>, window_params = [{transform_indices = @transform_0, window_bounds = array<i64: 4, 32, 200>}, {pipeline_mode = #tpu.pipeline_mode<synchronous>, transform_indices = @transform_1, window_bounds = array<i64: 200, 128>}, {pipeline_mode = #tpu.pipeline_mode<synchronous>, transform_indices = @transform_2, window_bounds = array<i64: 1, 128>}, {transform_indices = @transform_3, window_bounds = array<i64: 32, 16>}]} {
    %c0 = arith.constant 0 : index
    %c0_0 = arith.constant 0 : index
    %0 = vector.load %arg2[%c0, %c0_0] : memref<200x128xbf16, #tpu.memory_space<vmem>>, vector<200x128xbf16>
    %c0_1 = arith.constant 0 : index
    %c0_2 = arith.constant 0 : index
    %c0_3 = arith.constant 0 : index
    %1 = vector.load %arg1[%c0_1, %c0_2, %c0_3] : memref<4x32x200xbf16, #tpu.memory_space<vmem>>, vector<1x32x200xbf16>
    %2 = vector.shape_cast %1 : vector<1x32x200xbf16> to vector<32x200xbf16>
    %cst = arith.constant dense<0.000000e+00> : vector<32x128xf32>
    %3 = tpu.matmul %2, %0, %cst {dimension_numbers = #tpu.dot_dimension_numbers<[1], [0], [0], [1], [0, 0, 1, 1], [], []>} : vector<32x200xbf16>, vector<200x128xbf16>, vector<32x128xf32> -> vector<32x128xf32>
    %c1 = arith.constant 1 : index
    %c0_4 = arith.constant 0 : index
    %c0_5 = arith.constant 0 : index
    %4 = vector.load %arg1[%c1, %c0_4, %c0_5] : memref<4x32x200xbf16, #tpu.memory_space<vmem>>, vector<1x32x200xbf16>
    %5 = vector.shape_cast %4 : vector<1x32x200xbf16> to vector<32x200xbf16>
    %cst_6 = arith.constant dense<0.000000e+00> : vector<32x128xf32>
    %6 = tpu.matmul %5, %0, %cst_6 {dimension_numbers = #tpu.dot_dimension_numbers<[1], [0], [0], [1], [0, 0, 1, 1], [], []>} : vector<32x200xbf16>, vector<200x128xbf16>, vector<32x128xf32> -> vector<32x128xf32>
    %c2 = arith.constant 2 : index
    %c0_7 = arith.constant 0 : index
    %c0_8 = arith.constant 0 : index
    %7 = vector.load %arg1[%c2, %c0_7, %c0_8] : memref<4x32x200xbf16, #tpu.memory_space<vmem>>, vector<1x32x200xbf16>
    %8 = vector.shape_cast %7 : vector<1x32x200xbf16> to vector<32x200xbf16>
    %cst_9 = arith.constant dense<0.000000e+00> : vector<32x128xf32>
    %9 = tpu.matmul %8, %0, %cst_9 {dimension_numbers = #tpu.dot_dimension_numbers<[1], [0], [0], [1], [0, 0, 1, 1], [], []>} : vector<32x200xbf16>, vector<200x128xbf16>, vector<32x128xf32> -> vector<32x128xf32>
    %c3 = arith.constant 3 : index
    %c0_10 = arith.constant 0 : index
    %c0_11 = arith.constant 0 : index
    %10 = vector.load %arg1[%c3, %c0_10, %c0_11] : memref<4x32x200xbf16, #tpu.memory_space<vmem>>, vector<1x32x200xbf16>
    %11 = vector.shape_cast %10 : vector<1x32x200xbf16> to vector<32x200xbf16>
    %cst_12 = arith.constant dense<0.000000e+00> : vector<32x128xf32>
    %12 = tpu.matmul %11, %0, %cst_12 {dimension_numbers = #tpu.dot_dimension_numbers<[1], [0], [0], [1], [0, 0, 1, 1], [], []>} : vector<32x200xbf16>, vector<200x128xbf16>, vector<32x128xf32> -> vector<32x128xf32>
    %13 = arith.maximumf %3, %6 : vector<32x128xf32>
    %14 = arith.maximumf %9, %12 : vector<32x128xf32>
    %15 = arith.maximumf %13, %14 : vector<32x128xf32>
    %c0_13 = arith.constant 0 : index
    %c0_14 = arith.constant 0 : index
    %16 = vector.load %arg3[%c0_13, %c0_14] : memref<1x128xf32, #tpu.memory_space<vmem>>, vector<1x128xf32>
    %17 = vector.broadcast %16 : vector<1x128xf32> to vector<32x128xf32>
    %18 = arith.addf %15, %17 : vector<32x128xf32>
    %cst_15 = arith.constant 0.000000e+00 : f32
    %19 = vector.broadcast %cst_15 : f32 to vector<32x128xf32>
    %20 = arith.maximumf %18, %19 : vector<32x128xf32>
    %21 = vector.extract_strided_slice %20 {offsets = [0, 0], sizes = [32, 16], strides = [1, 1]} : vector<32x128xf32> to vector<32x16xf32>
    %22 = arith.truncf %21 : vector<32x16xf32> to vector<32x16xbf16>
    %c0_16 = arith.constant 0 : index
    %c0_17 = arith.constant 0 : index
    %23 = vector.load %arg4[%c0_16, %c0_17] : memref<32x16xbf16, #tpu.memory_space<vmem>>, vector<32x16xbf16>
    tpu.vector_store %arg4[%c0_16, %c0_17], %22 {strides = array<i32>} : memref<32x16xbf16, #tpu.memory_space<vmem>>, vector<32x16xbf16>,
    return
  }
  func.func @transform_0(%arg0: i32) -> (i32, i32, i32) {
    %c0_i32 = arith.constant 0 : i32
    %c0_i32_0 = arith.constant 0 : i32
    %c0_i32_1 = arith.constant 0 : i32
    return %c0_i32, %arg0, %c0_i32_0 : i32, i32, i32
  }
  func.func @transform_1(%arg0: i32) -> (i32, i32) {
    %c0_i32 = arith.constant 0 : i32
    %c0_i32_0 = arith.constant 0 : i32
    %c0_i32_1 = arith.constant 0 : i32
    return %c0_i32, %c0_i32_0 : i32, i32
  }
  func.func @transform_2(%arg0: i32) -> (i32, i32) {
    %c0_i32 = arith.constant 0 : i32
    %c0_i32_0 = arith.constant 0 : i32
    %c0_i32_1 = arith.constant 0 : i32
    return %c0_i32, %c0_i32_0 : i32, i32
  }
  func.func @transform_3(%arg0: i32) -> (i32, i32) {
    %c0_i32 = arith.constant 0 : i32
    %c0_i32_0 = arith.constant 0 : i32
    return %arg0, %c0_i32 : i32, i32
  }
}

module attributes {stable_mosaic.version = 11 : i64} {
  func.func @_fc_head_kernel(%arg0: i32, %arg1: memref<8x400xbf16, #tpu.memory_space<vmem>>, %arg2: memref<400x128xbf16, #tpu.memory_space<vmem>>, %arg3: memref<1x128xf32, #tpu.memory_space<vmem>>, %arg4: memref<128x128xbf16, #tpu.memory_space<vmem>>, %arg5: memref<1x128xf32, #tpu.memory_space<vmem>>, %arg6: memref<128x128xbf16, #tpu.memory_space<vmem>>, %arg7: memref<1x128xf32, #tpu.memory_space<vmem>>, %arg8: memref<8x128xf32, #tpu.memory_space<vmem>>) attributes {dimension_semantics = [#tpu.dimension_semantics<parallel>], iteration_bounds = array<i64: 2>, scalar_prefetch = 0 : i64, scratch_operands = 0 : i64, tpu.core_type = #tpu.core_type<tc>, window_params = [{transform_indices = @transform_0, window_bounds = array<i64: 8, 400>}, {pipeline_mode = #tpu.pipeline_mode<synchronous>, transform_indices = @transform_1, window_bounds = array<i64: 400, 128>}, {pipeline_mode = #tpu.pipeline_mode<synchronous>, transform_indices = @transform_2, window_bounds = array<i64: 1, 128>}, {pipeline_mode = #tpu.pipeline_mode<synchronous>, transform_indices = @transform_3, window_bounds = array<i64: 128, 128>}, {pipeline_mode = #tpu.pipeline_mode<synchronous>, transform_indices = @transform_4, window_bounds = array<i64: 1, 128>}, {pipeline_mode = #tpu.pipeline_mode<synchronous>, transform_indices = @transform_5, window_bounds = array<i64: 128, 128>}, {pipeline_mode = #tpu.pipeline_mode<synchronous>, transform_indices = @transform_6, window_bounds = array<i64: 1, 128>}, {transform_indices = @transform_7, window_bounds = array<i64: 8, 128>}]} {
    %c0 = arith.constant 0 : index
    %c0_0 = arith.constant 0 : index
    %0 = vector.load %arg1[%c0, %c0_0] : memref<8x400xbf16, #tpu.memory_space<vmem>>, vector<8x400xbf16>
    %c0_1 = arith.constant 0 : index
    %c0_2 = arith.constant 0 : index
    %1 = vector.load %arg2[%c0_1, %c0_2] : memref<400x128xbf16, #tpu.memory_space<vmem>>, vector<400x128xbf16>
    %cst = arith.constant dense<0.000000e+00> : vector<8x128xf32>
    %2 = tpu.matmul %0, %1, %cst {dimension_numbers = #tpu.dot_dimension_numbers<[1], [0], [0], [1], [0, 0, 1, 1], [], []>} : vector<8x400xbf16>, vector<400x128xbf16>, vector<8x128xf32> -> vector<8x128xf32>
    %c0_3 = arith.constant 0 : index
    %c0_4 = arith.constant 0 : index
    %3 = vector.load %arg3[%c0_3, %c0_4] : memref<1x128xf32, #tpu.memory_space<vmem>>, vector<1x128xf32>
    %4 = vector.broadcast %3 : vector<1x128xf32> to vector<8x128xf32>
    %5 = arith.addf %2, %4 : vector<8x128xf32>
    %cst_5 = arith.constant 0.000000e+00 : f32
    %6 = vector.broadcast %cst_5 : f32 to vector<8x128xf32>
    %7 = arith.maximumf %5, %6 : vector<8x128xf32>
    %8 = arith.truncf %7 : vector<8x128xf32> to vector<8x128xbf16>
    %c0_6 = arith.constant 0 : index
    %c0_7 = arith.constant 0 : index
    %9 = vector.load %arg4[%c0_6, %c0_7] : memref<128x128xbf16, #tpu.memory_space<vmem>>, vector<128x128xbf16>
    %cst_8 = arith.constant dense<0.000000e+00> : vector<8x128xf32>
    %10 = tpu.matmul %8, %9, %cst_8 {dimension_numbers = #tpu.dot_dimension_numbers<[1], [0], [0], [1], [0, 0, 1, 1], [], []>} : vector<8x128xbf16>, vector<128x128xbf16>, vector<8x128xf32> -> vector<8x128xf32>
    %c0_9 = arith.constant 0 : index
    %c0_10 = arith.constant 0 : index
    %11 = vector.load %arg5[%c0_9, %c0_10] : memref<1x128xf32, #tpu.memory_space<vmem>>, vector<1x128xf32>
    %12 = vector.broadcast %11 : vector<1x128xf32> to vector<8x128xf32>
    %13 = arith.addf %10, %12 : vector<8x128xf32>
    %cst_11 = arith.constant 0.000000e+00 : f32
    %14 = vector.broadcast %cst_11 : f32 to vector<8x128xf32>
    %15 = arith.maximumf %13, %14 : vector<8x128xf32>
    %16 = arith.truncf %15 : vector<8x128xf32> to vector<8x128xbf16>
    %c0_12 = arith.constant 0 : index
    %c0_13 = arith.constant 0 : index
    %17 = vector.load %arg6[%c0_12, %c0_13] : memref<128x128xbf16, #tpu.memory_space<vmem>>, vector<128x128xbf16>
    %cst_14 = arith.constant dense<0.000000e+00> : vector<8x128xf32>
    %18 = tpu.matmul %16, %17, %cst_14 {dimension_numbers = #tpu.dot_dimension_numbers<[1], [0], [0], [1], [0, 0, 1, 1], [], []>} : vector<8x128xbf16>, vector<128x128xbf16>, vector<8x128xf32> -> vector<8x128xf32>
    %c0_15 = arith.constant 0 : index
    %c0_16 = arith.constant 0 : index
    %19 = vector.load %arg7[%c0_15, %c0_16] : memref<1x128xf32, #tpu.memory_space<vmem>>, vector<1x128xf32>
    %20 = vector.broadcast %19 : vector<1x128xf32> to vector<8x128xf32>
    %21 = arith.addf %18, %20 : vector<8x128xf32>
    %c0_17 = arith.constant 0 : index
    %c0_18 = arith.constant 0 : index
    %22 = vector.load %arg8[%c0_17, %c0_18] : memref<8x128xf32, #tpu.memory_space<vmem>>, vector<8x128xf32>
    tpu.vector_store %arg8[%c0_17, %c0_18], %21 {strides = array<i32>} : memref<8x128xf32, #tpu.memory_space<vmem>>, vector<8x128xf32>,
    return
  }
  func.func @transform_0(%arg0: i32) -> (i32, i32) {
    %c0_i32 = arith.constant 0 : i32
    %c0_i32_0 = arith.constant 0 : i32
    return %arg0, %c0_i32 : i32, i32
  }
  func.func @transform_1(%arg0: i32) -> (i32, i32) {
    %c0_i32 = arith.constant 0 : i32
    %c0_i32_0 = arith.constant 0 : i32
    %c0_i32_1 = arith.constant 0 : i32
    return %c0_i32, %c0_i32_0 : i32, i32
  }
  func.func @transform_2(%arg0: i32) -> (i32, i32) {
    %c0_i32 = arith.constant 0 : i32
    %c0_i32_0 = arith.constant 0 : i32
    %c0_i32_1 = arith.constant 0 : i32
    return %c0_i32, %c0_i32_0 : i32, i32
  }
  func.func @transform_3(%arg0: i32) -> (i32, i32) {
    %c0_i32 = arith.constant 0 : i32
    %c0_i32_0 = arith.constant 0 : i32
    %c0_i32_1 = arith.constant 0 : i32
    return %c0_i32, %c0_i32_0 : i32, i32
  }
  func.func @transform_4(%arg0: i32) -> (i32, i32) {
    %c0_i32 = arith.constant 0 : i32
    %c0_i32_0 = arith.constant 0 : i32
    %c0_i32_1 = arith.constant 0 : i32
    return %c0_i32, %c0_i32_0 : i32, i32
  }
  func.func @transform_5(%arg0: i32) -> (i32, i32) {
    %c0_i32 = arith.constant 0 : i32
    %c0_i32_0 = arith.constant 0 : i32
    %c0_i32_1 = arith.constant 0 : i32
    return %c0_i32, %c0_i32_0 : i32, i32
  }
  func.func @transform_6(%arg0: i32) -> (i32, i32) {
    %c0_i32 = arith.constant 0 : i32
    %c0_i32_0 = arith.constant 0 : i32
    %c0_i32_1 = arith.constant 0 : i32
    return %c0_i32, %c0_i32_0 : i32, i32
  }
  func.func @transform_7(%arg0: i32) -> (i32, i32) {
    %c0_i32 = arith.constant 0 : i32
    %c0_i32_0 = arith.constant 0 : i32
    return %arg0, %c0_i32 : i32, i32
  }
}

</mosaic_0001>

<bundles_post_ra>
// kernel: net_forward.3
= control target key start
LH: loop header
LB: loop body
LE: loop exit
PB: predicated region body
PF: predicated region fallthrough
CT: control target
= control target key end

     0   :  { %s2181_s12 = smov 0   ;;  %s2183_s13 = smov 0   ;;  %s2547_s0 = inlined_call_operand.vmem [shape: bf16[4,400,75], index: 0, kind: input, shape index: {}]   ;;  %s2548_s1 = inlined_call_operand.vmem [shape: bf16[75,128], index: 1, kind: input, shape index: {}]   ;;  %s2549_s2 = inlined_call_operand.vmem [shape: f32[1,128], index: 2, kind: input, shape index: {}]   ;;  %s2550_s3 = inlined_call_operand.vmem [shape: bf16[400,8], index: 3, kind: output, shape index: {}]  }
   0x1   :  { %s2185_s14 = smov 0  }
   0x2 LB: > { %s1706_s15 = sadd.s32 4294967295, %s2158_s14   ;;  %s2198_s16 = sadd.s32 1, %s2158_s14   ;;  %s2158_s14 = sphi %s2185_s14, %s2553_s14   ;;  %s2154_s13 = sphi %s2183_s13, %s2552_s13   ;;  %s2150_s12 = sphi %s2181_s12, %s2551_s12  }
   0x3   : > { %s17_s17 = ssub.s32 %s2158_s14, %s2198_s16  ;;  %s20_s18 = sadd.s32 1, %s2154_s13 }
   0x4   : > { %p18_p0 = scmp.eq.s32.totalorder %s17_s17, 0  ;;  %p27_p1 = scmp.ne.s32.totalorder %s2154_s13, %s2150_s12 }
   0x5   : > { %p28_p2 = scmp.eq.s32.totalorder %s2158_s14, 0  ;;  %p1709_p4 = scmp.ge.s32.totalorder %s2158_s14, 2 }
   0x6   : > { %s2207_s19 = scalar_select %p18_p0, %s2154_s13, %s20_s18  }
   0x7   : > { %p29_p3 = por %p28_p2, %p27_p1  ;;  %127 = sbr.rel (%p1709_p4) target bundleno = 69 (0x45), region = 24 }
   0xc   : > { %130 = sbr.rel (!%p29_p3) target bundleno = 69 (0x45), region = 28  ;;  %s132_s20 = sand.u32 (%p29_p3), 1, %s2154_s13  }
   0xd   : > { %s2054_s21 = smul.u32 (%p29_p3), 100, %s2158_s14 }
   0xe   : > { %s2108_s22 = smul.u32 (%p29_p3), 400, %s132_s20 }
   0xf   : > { %s2215_s25 = scalar_lea.vmem (%p29_p3), %s2547_s0, %s2054_s21 }
  0x10   : > { %v154_v0 = vld [vmem:[%s2215_s25] sm:$0xff] (%p29_p3)   ;;  %v158_v1 = vld [vmem:[%s2215_s25 + $0x8] sm:$0xff] (%p29_p3)   ;;  %v162_v2 = vld [vmem:[%s2215_s25 + $0x10] sm:$0xff] (%p29_p3)   ;;  %s2220_s26 = scalar_lea.vmem (%p29_p3), [#allocation2], %s2108_s22 }
  0x11   : > { %155 = vst [vmem:[%s2220_s26] sm:$0xff] %v154_v0   ;;  %v166_v3 = vld [vmem:[%s2215_s25 + $0x18] sm:$0xff]   ;;  %v170_v4 = vld [vmem:[%s2215_s25 + $0x20] sm:$0xff]   ;;  %v174_v5 = vld [vmem:[%s2215_s25 + $0x28] sm:$0xff]  }
  0x12   : > { %159 = vst [vmem:[%s2220_s26 + $0x8] sm:$0xff] %v158_v1   ;;  %v178_v6 = vld [vmem:[%s2215_s25 + $0x30] sm:$0xff]   ;;  %v182_v7 = vld [vmem:[%s2215_s25 + $0x38] sm:$0xff]   ;;  %v186_v8 = vld [vmem:[%s2215_s25 + $0x40] sm:$0xff]  }
  0x13   : > { %163 = vst [vmem:[%s2220_s26 + $0x10] sm:$0xff] %v162_v2   ;;  %v190_v9 = vld [vmem:[%s2215_s25 + $0x48] sm:$0xff]   ;;  %v194_v10 = vld [vmem:[%s2215_s25 + $0x50] sm:$0xff]   ;;  %v198_v11 = vld [vmem:[%s2215_s25 + $0x58] sm:$0xff]  }
  0x14   : > { %167 = vst [vmem:[%s2220_s26 + $0x18] sm:$0xff] %v166_v3   ;;  %v202_v12 = vld [vmem:[%s2215_s25 + $0x60] sm:$0xf]  ;;  %v204_v13 = vld [vmem:[%s2215_s25 + $0xc8] sm:$0xff]   ;;  %v208_v14 = vld [vmem:[%s2215_s25 + $0xd0] sm:$0xff]  }
  0x15   : > { %171 = vst [vmem:[%s2220_s26 + $0x20] sm:$0xff] %v170_v4   ;;  %v212_v15 = vld [vmem:[%s2215_s25 + $0xd8] sm:$0xff]   ;;  %v216_v16 = vld [vmem:[%s2215_s25 + $0xe0] sm:$0xff]   ;;  %v220_v17 = vld [vmem:[%s2215_s25 + $0xe8] sm:$0xff]  }
  0x16   : > { %175 = vst [vmem:[%s2220_s26 + $0x28] sm:$0xff] %v174_v5   ;;  %v224_v18 = vld [vmem:[%s2215_s25 + $0xf0] sm:$0xff]   ;;  %v228_v19 = vld [vmem:[%s2215_s25 + $0xf8] sm:$0xff]   ;;  %v232_v20 = vld [vmem:[%s2215_s25 + $0x100] sm:$0xff]  }
  0x17   : > { %179 = vst [vmem:[%s2220_s26 + $0x30] sm:$0xff] %v178_v6   ;;  %v236_v21 = vld [vmem:[%s2215_s25 + $0x108] sm:$0xff]   ;;  %v240_v22 = vld [vmem:[%s2215_s25 + $0x110] sm:$0xff]   ;;  %v244_v23 = vld [vmem:[%s2215_s25 + $0x118] sm:$0xff]  }
  0x18   : > { %183 = vst [vmem:[%s2220_s26 + $0x38] sm:$0xff] %v182_v7   ;;  %v248_v24 = vld [vmem:[%s2215_s25 + $0x120] sm:$0xff]   ;;  %v252_v25 = vld [vmem:[%s2215_s25 + $0x128] sm:$0xf]  ;;  %v254_v26 = vld [vmem:[%s2215_s25 + $0x190] sm:$0xff]  }
  0x19   : > { %187 = vst [vmem:[%s2220_s26 + $0x40] sm:$0xff] %v186_v8   ;;  %v258_v27 = vld [vmem:[%s2215_s25 + $0x198] sm:$0xff]   ;;  %v262_v28 = vld [vmem:[%s2215_s25 + $0x1a0] sm:$0xff]   ;;  %v266_v29 = vld [vmem:[%s2215_s25 + $0x1a8] sm:$0xff]  }
  0x1a   : > { %191 = vst [vmem:[%s2220_s26 + $0x48] sm:$0xff] %v190_v9   ;;  %v270_v30 = vld [vmem:[%s2215_s25 + $0x1b0] sm:$0xff]   ;;  %v274_v31 = vld [vmem:[%s2215_s25 + $0x1b8] sm:$0xff]   ;;  %v278_v32 = vld [vmem:[%s2215_s25 + $0x1c0] sm:$0xff]  }
  0x1b   : > { %195 = vst [vmem:[%s2220_s26 + $0x50] sm:$0xff] %v194_v10   ;;  %v282_v33 = vld [vmem:[%s2215_s25 + $0x1c8] sm:$0xff]   ;;  %v286_v34 = vld [vmem:[%s2215_s25 + $0x1d0] sm:$0xff]   ;;  %v290_v35 = vld [vmem:[%s2215_s25 + $0x1d8] sm:$0xff]  }
  0x1c   : > { %199 = vst [vmem:[%s2220_s26 + $0x58] sm:$0xff] %v198_v11   ;;  %v294_v36 = vld [vmem:[%s2215_s25 + $0x1e0] sm:$0xff]   ;;  %v298_v37 = vld [vmem:[%s2215_s25 + $0x1e8] sm:$0xff]   ;;  %v302_v38 = vld [vmem:[%s2215_s25 + $0x1f0] sm:$0xf] }
  0x1d   : > { %203 = vst [vmem:[%s2220_s26 + $0x60] sm:$0xf] %v202_v12  ;;  %v304_v39 = vld [vmem:[%s2215_s25 + $0x258] sm:$0xff]   ;;  %v308_v40 = vld [vmem:[%s2215_s25 + $0x260] sm:$0xff]   ;;  %v312_v41 = vld [vmem:[%s2215_s25 + $0x268] sm:$0xff]  }
  0x1e   : > { %205 = vst [vmem:[%s2220_s26 + $0x64] sm:$0xff] %v204_v13   ;;  %v316_v42 = vld [vmem:[%s2215_s25 + $0x270] sm:$0xff]   ;;  %v320_v43 = vld [vmem:[%s2215_s25 + $0x278] sm:$0xff]   ;;  %v324_v44 = vld [vmem:[%s2215_s25 + $0x280] sm:$0xff]  }
  0x1f   : > { %209 = vst [vmem:[%s2220_s26 + $0x6c] sm:$0xff] %v208_v14   ;;  %v328_v45 = vld [vmem:[%s2215_s25 + $0x288] sm:$0xff]   ;;  %v332_v46 = vld [vmem:[%s2215_s25 + $0x290] sm:$0xff]   ;;  %v336_v47 = vld [vmem:[%s2215_s25 + $0x298] sm:$0xff]  }
  0x20   : > { %213 = vst [vmem:[%s2220_s26 + $0x74] sm:$0xff] %v212_v15   ;;  %v340_v48 = vld [vmem:[%s2215_s25 + $0x2a0] sm:$0xff]   ;;  %v344_v49 = vld [vmem:[%s2215_s25 + $0x2a8] sm:$0xff]   ;;  %v348_v50 = vld [vmem:[%s2215_s25 + $0x2b0] sm:$0xff]  }
  0x21   : > { %217 = vst [vmem:[%s2220_s26 + $0x7c] sm:$0xff] %v216_v16   ;;  %v352_v51 = vld [vmem:[%s2215_s25 + $0x2b8] sm:$0xf] }
  0x22   : > { %221 = vst [vmem:[%s2220_s26 + $0x84] sm:$0xff] %v220_v17  }
  0x23   : > { %225 = vst [vmem:[%s2220_s26 + $0x8c] sm:$0xff] %v224_v18  }
  0x24   : > { %229 = vst [vmem:[%s2220_s26 + $0x94] sm:$0xff] %v228_v19  }
  0x25   : > { %233 = vst [vmem:[%s2220_s26 + $0x9c] sm:$0xff] %v232_v20  }
  0x26   : > { %237 = vst [vmem:[%s2220_s26 + $0xa4] sm:$0xff] %v236_v21  }
  0x27   : > { %241 = vst [vmem:[%s2220_s26 + $0xac] sm:$0xff] %v240_v22  }
  0x28   : > { %245 = vst [vmem:[%s2220_s26 + $0xb4] sm:$0xff] %v244_v23  }
  0x29   : > { %249 = vst [vmem:[%s2220_s26 + $0xbc] sm:$0xff] %v248_v24  }
  0x2a   : > { %253 = vst [vmem:[%s2220_s26 + $0xc4] sm:$0xf] %v252_v25 }
  0x2b   : > { %255 = vst [vmem:[%s2220_s26 + $0xc8] sm:$0xff] %v254_v26  }
  0x2c   : > { %259 = vst [vmem:[%s2220_s26 + $0xd0] sm:$0xff] %v258_v27  }
  0x2d   : > { %263 = vst [vmem:[%s2220_s26 + $0xd8] sm:$0xff] %v262_v28  }
  0x2e   : > { %267 = vst [vmem:[%s2220_s26 + $0xe0] sm:$0xff] %v266_v29  }
  0x2f   : > { %271 = vst [vmem:[%s2220_s26 + $0xe8] sm:$0xff] %v270_v30  }
  0x30   : > { %275 = vst [vmem:[%s2220_s26 + $0xf0] sm:$0xff] %v274_v31  }
  0x31   : > { %279 = vst [vmem:[%s2220_s26 + $0xf8] sm:$0xff] %v278_v32  }
  0x32   : > { %283 = vst [vmem:[%s2220_s26 + $0x100] sm:$0xff] %v282_v33  }
  0x33   : > { %287 = vst [vmem:[%s2220_s26 + $0x108] sm:$0xff] %v286_v34  }
  0x34   : > { %291 = vst [vmem:[%s2220_s26 + $0x110] sm:$0xff] %v290_v35  }
  0x35   : > { %295 = vst [vmem:[%s2220_s26 + $0x118] sm:$0xff] %v294_v36  }
  0x36   : > { %299 = vst [vmem:[%s2220_s26 + $0x120] sm:$0xff] %v298_v37  }
  0x37   : > { %303 = vst [vmem:[%s2220_s26 + $0x128] sm:$0xf] %v302_v38 }
  0x38   : > { %305 = vst [vmem:[%s2220_s26 + $0x12c] sm:$0xff] %v304_v39  }
  0x39   : > { %309 = vst [vmem:[%s2220_s26 + $0x134] sm:$0xff] %v308_v40  }
  0x3a   : > { %313 = vst [vmem:[%s2220_s26 + $0x13c] sm:$0xff] %v312_v41  }
  0x3b   : > { %317 = vst [vmem:[%s2220_s26 + $0x144] sm:$0xff] %v316_v42  }
  0x3c   : > { %321 = vst [vmem:[%s2220_s26 + $0x14c] sm:$0xff] %v320_v43  }
  0x3d   : > { %325 = vst [vmem:[%s2220_s26 + $0x154] sm:$0xff] %v324_v44  }
  0x3e   : > { %329 = vst [vmem:[%s2220_s26 + $0x15c] sm:$0xff] %v328_v45  }
  0x3f   : > { %333 = vst [vmem:[%s2220_s26 + $0x164] sm:$0xff] %v332_v46  }
  0x40   : > { %337 = vst [vmem:[%s2220_s26 + $0x16c] sm:$0xff] %v336_v47  }
  0x41   : > { %341 = vst [vmem:[%s2220_s26 + $0x174] sm:$0xff] %v340_v48  }
  0x42   : > { %345 = vst [vmem:[%s2220_s26 + $0x17c] sm:$0xff] %v344_v49  }
  0x43   : > { %349 = vst [vmem:[%s2220_s26 + $0x184] sm:$0xff] %v348_v50  }
  0x44   : > { %353 = vst [vmem:[%s2220_s26 + $0x18c] sm:$0xf] %v352_v51 }
  0x45 PF: > { %p1711_p5 = scmp.ge.s32.totalorder %s2158_s14, 1  ;;  %p576_p6 = scmp.lt.s32.totalorder %s2158_s14, 3 }
  0x47   : > { %p577_p7 = pnand %p1711_p5, %p576_p6 }
  0x48   : > { %s583_s8 = sand.u32 (!%p577_p7), 1, %s2150_s12   ;;  %s607_s12 = smul.u32 (!%p577_p7), 25, %s1706_s15 }
  0x49   : > { %580 = sbr.rel (%p577_p7) target bundleno = 439 (0x1b7), region = 69 }
  0x4a   : > { %s2109_s11 = smul.u32 (!%p577_p7), 400, %s583_s8  ;;  %p608_p8 = scmp.lt.s32.totalorder (!%p577_p7), %s607_s12, 49 }
  0x4c   : > { %s2344_s20 = scalar_lea.vmem (!%p577_p7), [#allocation2], %s2109_s11 }
  0x4e   : > { %v1779_v52 = vld [vmem:[%s2548_s1 + $0x20] sm:$0xf]  ;;  %v2059_v53 = vld [vmem:[%s2548_s1 + $0x20] sm:$0x30]  ;;  %vm781_vm0 = vcmask 1044480   ;;  %vm782_vm1 = vcmask 1045504  }
  0x4f   : > { %v1780_v54 = vor.u32 %v2059_v53, %v1779_v52  ;;  %v2160_v55 = vmov 65535   ;;  %v2058_v59 = vld [vmem:[%s2548_s1 + $0x18] sm:$0xff]  ;;  %v2057_v60 = vld [vmem:[%s2548_s1 + $0x10] sm:$0xff]  ;;  %v2056_v61 = vld [vmem:[%s2548_s1 + $0x8] sm:$0xff]  ;;  %vm741_vm2 = vcmask 613376   ;;  %s2555_s12 = smov (!%p608_p8, %s607_s12), 49 }
  0x50   : > { %v783_v56 = vsel %vm781_vm0, 4294967295, %v2160_v55  ;;  %v2055_v62 = vld [vmem:[%s2548_s1] sm:$0xff]  ;;  %v2084_v1 = vld [vmem:[%s2344_s20 + $0xc8] sm:$0xff]  ;;  %v2086_v9 = vld [vmem:[%s2344_s20 + $0xd8] sm:$0xff]  ;;  %s1712_s14 = sshll.u32 %s2555_s12, 2  ;;  %vm1618_vm3 = vcmask 60416  }
  0x51   : > { %v784_v57 = vsel %vm782_vm1, %v783_v56, 0  ;;  %v2060_v63 = vld [vmem:[%s2344_s20] sm:$0xff]  ;;  %v2096_v2 = vld [vmem:[%s2344_s20 + $0x12c] sm:$0xff]  ;;  %v2097_v6 = vld [vmem:[%s2344_s20 + $0x134] sm:$0xff]  ;;  %s2429_s24 = scalar_lea.vmem %s2550_s3, %s1712_s14 }
  0x52   : > { %v786_v58 = vand.u32 %v1780_v54, %v784_v57  ;;  %v2072_v0 = vld [vmem:[%s2344_s20 + $0x64] sm:$0xff]  ;;  %v2073_v4 = vld [vmem:[%s2344_s20 + $0x6c] sm:$0xff]  ;;  %v2074_v8 = vld [vmem:[%s2344_s20 + $0x74] sm:$0xff] }
  0x53   : > { %v2061_v3 = vld [vmem:[%s2344_s20 + $0x8] sm:$0xff]  ;;  %v2085_v5 = vld [vmem:[%s2344_s20 + $0xd0] sm:$0xff]  ;;  %v2098_v10 = vld [vmem:[%s2344_s20 + $0x13c] sm:$0xff] }
  0x54   : > { %791 = vmatpush.bf16.msra.mxu0 %v786_v58  ;;  %992 = vmatpush.bf16.msra.mxu1 %v786_v58  ;;  %v2062_v7 = vld [vmem:[%s2344_s20 + $0x10] sm:$0xff]  ;;  %v2063_v11 = vld [vmem:[%s2344_s20 + $0x18] sm:$0xff]  ;;  %v2087_v13 = vld [vmem:[%s2344_s20 + $0xe0] sm:$0xff] }
  0x55   : > { %1193 = vmatpush.bf16.msra.mxu2 %v786_v58  ;;  %1394 = vmatpush.bf16.msra.mxu3 %v786_v58  ;;  %v2075_v12 = vld [vmem:[%s2344_s20 + $0x7c] sm:$0xff]  ;;  %v2099_v14 = vld [vmem:[%s2344_s20 + $0x144] sm:$0xff]  ;;  %v2100_v18 = vld [vmem:[%s2344_s20 + $0x14c] sm:$0xff] }
  0x56   : > { %v2064_v15 = vld [vmem:[%s2344_s20 + $0x20] sm:$0xff]  ;;  %v2088_v17 = vld [vmem:[%s2344_s20 + $0xe8] sm:$0xff]  ;;  %v2089_v21 = vld [vmem:[%s2344_s20 + $0xf0] sm:$0xff] }
  0x57   : > { %v2076_v16 = vld [vmem:[%s2344_s20 + $0x84] sm:$0xff]  ;;  %v2077_v20 = vld [vmem:[%s2344_s20 + $0x8c] sm:$0xff]  ;;  %v2101_v22 = vld [vmem:[%s2344_s20 + $0x154] sm:$0xff] }
  0x58   : > { %792 = vmatpush.bf16.msra.mxu0 %v2058_v59  ;;  %993 = vmatpush.bf16.msra.mxu1 %v2058_v59  ;;  %v2065_v19 = vld [vmem:[%s2344_s20 + $0x28] sm:$0xff]  ;;  %v2066_v23 = vld [vmem:[%s2344_s20 + $0x30] sm:$0xff]  ;;  %v2090_v25 = vld [vmem:[%s2344_s20 + $0xf8] sm:$0xff] }
  0x59   : > { %1194 = vmatpush.bf16.msra.mxu2 %v2058_v59  ;;  %1395 = vmatpush.bf16.msra.mxu3 %v2058_v59  ;;  %v2078_v24 = vld [vmem:[%s2344_s20 + $0x94] sm:$0xff]  ;;  %v2102_v26 = vld [vmem:[%s2344_s20 + $0x15c] sm:$0xff]  ;;  %v2103_v30 = vld [vmem:[%s2344_s20 + $0x164] sm:$0xff] }
  0x5a   : > { %v2067_v27 = vld [vmem:[%s2344_s20 + $0x38] sm:$0xff]  ;;  %v2091_v29 = vld [vmem:[%s2344_s20 + $0x100] sm:$0xff]  ;;  %v2092_v35 = vld [vmem:[%s2344_s20 + $0x108] sm:$0xff] }
  0x5b   : > { %v2079_v28 = vld [vmem:[%s2344_s20 + $0x9c] sm:$0xff]  ;;  %v2080_v32 = vld [vmem:[%s2344_s20 + $0xa4] sm:$0xff]  ;;  %v2104_v36 = vld [vmem:[%s2344_s20 + $0x16c] sm:$0xff] }
  0x5c   : > { %793 = vmatpush.bf16.msra.mxu0 %v2057_v60  ;;  %994 = vmatpush.bf16.msra.mxu1 %v2057_v60  ;;  %v2068_v31 = vld [vmem:[%s2344_s20 + $0x40] sm:$0xff]  ;;  %v2069_v49 = vld [vmem:[%s2344_s20 + $0x48] sm:$0xff]  ;;  %v2093_v56 = vld [vmem:[%s2344_s20 + $0x110] sm:$0xff] }
  0x5d   : > { %1195 = vmatpush.bf16.msra.mxu2 %v2057_v60  ;;  %1396 = vmatpush.bf16.msra.mxu3 %v2057_v60  ;;  %v2423_v41 = vld [vmem:[%s2549_s2] ss:$0 sm:$0xff]  ;;  %v2105_v57 = vld [vmem:[%s2344_s20 + $0x174] sm:$0xff] }
  0x5e   : > { %v2081_v50 = vld [vmem:[%s2344_s20 + $0xac] sm:$0xff] }
  0x60   : > { %794 = vmatpush.bf16.msra.mxu0 %v2056_v61  ;;  %995 = vmatpush.bf16.msra.mxu1 %v2056_v61 }
  0x61   : > { %1196 = vmatpush.bf16.msra.mxu2 %v2056_v61  ;;  %1397 = vmatpush.bf16.msra.mxu3 %v2056_v61 }
  0x64   : > { %795 = vmatpush.bf16.msra.mxu0 %v2055_v62  ;;  %996 = vmatpush.bf16.msra.mxu1 %v2055_v62 }
  0x65   : > { %1197 = vmatpush.bf16.msra.mxu2 %v2055_v62  ;;  %1398 = vmatpush.bf16.msra.mxu3 %v2055_v62 }
  0x67   : > { %1781 = vmatmul.msk.bf16.vlgmr.msra.gmra.mxu0 %vm741_vm2, %v2060_v63  ;;  %1867 = vmatmul.msk.bf16.vlgmr.msra.gmra.mxu1 %vm741_vm2, %v2072_v0 }
  0x68   : > { %1953 = vmatmul.msk.bf16.vlgmr.msra.gmra.mxu2 %vm741_vm2, %v2084_v1  ;;  %2039 = vmatmul.msk.bf16.vlgmr.msra.gmra.mxu3 %vm741_vm2, %v2096_v2 }
  0x77   : > { %1782 = vmatmul.msk.bf16.gmra.mxu0 %vm741_vm2, %v2061_v3  ;;  %1868 = vmatmul.msk.bf16.gmra.mxu1 %vm741_vm2, %v2073_v4 }
  0x78   : > { %1954 = vmatmul.msk.bf16.gmra.mxu2 %vm741_vm2, %v2085_v5  ;;  %2040 = vmatmul.msk.bf16.gmra.mxu3 %vm741_vm2, %v2097_v6 }
  0x87   : > { %1783 = vmatmul.msk.bf16.gmra.mxu0 %vm741_vm2, %v2062_v7  ;;  %1869 = vmatmul.msk.bf16.gmra.mxu1 %vm741_vm2, %v2074_v8 }
  0x88   : > { %1955 = vmatmul.msk.bf16.gmra.mxu2 %vm741_vm2, %v2086_v9  ;;  %2041 = vmatmul.msk.bf16.gmra.mxu3 %vm741_vm2, %v2098_v10  ;;  %v2070_v9 = vld [vmem:[%s2344_s20 + $0x50] sm:$0xff] }
  0x89   : > { %v2082_v10 = vld [vmem:[%s2344_s20 + $0xb4] sm:$0xff] }
  0x97   : > { %1784 = vmatmul.msk.bf16.gmra.mxu0 %vm741_vm2, %v2063_v11  ;;  %1870 = vmatmul.msk.bf16.gmra.mxu1 %vm741_vm2, %v2075_v12 }
  0x98   : > { %1956 = vmatmul.msk.bf16.gmra.mxu2 %vm741_vm2, %v2087_v13  ;;  %2042 = vmatmul.msk.bf16.gmra.mxu3 %vm741_vm2, %v2099_v14 }
  0xa7   : > { %1785 = vmatmul.msk.bf16.gmra.mxu0 %vm741_vm2, %v2064_v15  ;;  %1871 = vmatmul.msk.bf16.gmra.mxu1 %vm741_vm2, %v2076_v16  ;;  %v2094_v16 = vld [vmem:[%s2344_s20 + $0x118] sm:$0xff] }
  0xa8   : > { %1957 = vmatmul.msk.bf16.gmra.mxu2 %vm741_vm2, %v2088_v17  ;;  %2043 = vmatmul.msk.bf16.gmra.mxu3 %vm741_vm2, %v2100_v18  ;;  %v2106_v17 = vld [vmem:[%s2344_s20 + $0x17c] sm:$0xff] }
  0xb7   : > { %1786 = vmatmul.msk.bf16.gmra.mxu0 %vm741_vm2, %v2065_v19  ;;  %1872 = vmatmul.msk.bf16.gmra.mxu1 %vm741_vm2, %v2077_v20 }
  0xb8   : > { %1958 = vmatmul.msk.bf16.gmra.mxu2 %vm741_vm2, %v2089_v21  ;;  %2044 = vmatmul.msk.bf16.gmra.mxu3 %vm741_vm2, %v2101_v22 }
  0xc7   : > { %1787 = vmatmul.msk.bf16.gmra.mxu0 %vm741_vm2, %v2066_v23  ;;  %1873 = vmatmul.msk.bf16.gmra.mxu1 %vm741_vm2, %v2078_v24 }
  0xc8   : > { %1959 = vmatmul.msk.bf16.gmra.mxu2 %vm741_vm2, %v2090_v25  ;;  %2045 = vmatmul.msk.bf16.gmra.mxu3 %vm741_vm2, %v2102_v26 }
  0xd7   : > { %1788 = vmatmul.msk.bf16.gmra.mxu0 %vm741_vm2, %v2067_v27  ;;  %1874 = vmatmul.msk.bf16.gmra.mxu1 %vm741_vm2, %v2079_v28 }
  0xd8   : > { %1960 = vmatmul.msk.bf16.gmra.mxu2 %vm741_vm2, %v2091_v29  ;;  %2046 = vmatmul.msk.bf16.gmra.mxu3 %vm741_vm2, %v2103_v30 }
  0xe4   : > { %v797_v33 = vpop.f32.mrf.mxu0  ;;  %v998_v34 = vpop.f32.mrf.mxu1 }
  0xe5   : > { %v1464_v37 = vmax.f32 %v797_v33, %v998_v34  ;;  %v2071_v33 = vld [vmem:[%s2344_s20 + $0x58] sm:$0xff] }
  0xe6   : > { %v2083_v34 = vld [vmem:[%s2344_s20 + $0xbc] sm:$0xff] }
  0xe7   : > { %1789 = vmatmul.msk.bf16.gmra.mxu0 %vm741_vm2, %v2068_v31  ;;  %1875 = vmatmul.msk.bf16.gmra.mxu1 %vm741_vm2, %v2080_v32 }
  0xe8   : > { %1961 = vmatmul.msk.bf16.gmra.mxu2 %vm741_vm2, %v2092_v35  ;;  %2047 = vmatmul.msk.bf16.gmra.mxu3 %vm741_vm2, %v2104_v36 }
  0xeb   : > { %v1199_v38 = vpop.f32.mrf.mxu2  ;;  %v1400_v39 = vpop.f32.mrf.mxu3 }
  0xec   : > { %v1489_v40 = vmax.f32 %v1199_v38, %v1400_v39  ;;  %v799_v42 = vpop.f32.mrf.mxu0  ;;  %v1000_v43 = vpop.f32.mrf.mxu1 }
  0xed   : > { %v1465_v52 = vmax.f32 %v799_v42, %v1000_v43  ;;  %v2107_v42 = vld [vmem:[%s2344_s20 + $0x184] sm:$0xff] }
  0xee   : > { %v1514_v44 = vmax.f32 %v1464_v37, %v1489_v40  ;;  %v2095_v40 = vld [vmem:[%s2344_s20 + $0x120] sm:$0xff] }
  0xf0   : > { %v1543_v45 = vadd.f32 %v2423_v41, %v1514_v44 }
  0xf2   : > { %v1568_v46 = vmax.f32 %v1543_v45, 0.0 }
  0xf3   : > { %v1201_v47 = vpop.f32.mrf.mxu2  ;;  %v1402_v48 = vpop.f32.mrf.mxu3 }
  0xf4   : > { %v1593_v51 = vpack.c.bf16 %v1568_v46, %v1568_v46  ;;  %v1490_v53 = vmax.f32 %v1201_v47, %v1402_v48  ;;  %v802_v54 = vpop.f32.mrf.mxu0  ;;  %v1003_v55 = vpop.f32.mrf.mxu1 }
  0xf5   : > { %v1466_v61 = vmax.f32 %v802_v54, %v1003_v55  ;;  %v1818_v54 = vld [vmem:[%s2344_s20 + $0xc4] sm:$0xf]  ;;  %v1904_v55 = vld [vmem:[%s2344_s20 + $0x128] sm:$0xf] }
  0xf6   : > { %1619 = vst.msk [vmem:[%s2429_s24] sm:$0xf] %vm1618_vm3, %v1593_v51  ;;  %v1515_v58 = vmax.f32 %v1465_v52, %v1490_v53  ;;  %v648_v53 = vld [vmem:[%s2344_s20 + $0x60] sm:$0xf] }
  0xf7   : > { %1790 = vmatmul.msk.bf16.gmra.mxu0 %vm741_vm2, %v2069_v49  ;;  %1876 = vmatmul.msk.bf16.gmra.mxu1 %vm741_vm2, %v2081_v50 }
  0xf8   : > { %v1544_v59 = vadd.f32 %v2423_v41, %v1515_v58  ;;  %1962 = vmatmul.msk.bf16.gmra.mxu2 %vm741_vm2, %v2093_v56  ;;  %2048 = vmatmul.msk.bf16.gmra.mxu3 %vm741_vm2, %v2105_v57  ;;  %v1990_v56 = vld [vmem:[%s2344_s20 + $0x18c] sm:$0xf]  ;;  %v698_v58 = vunpack.c.l.b16 %v648_v53 }
  0xfa   : > { %v1569_v60 = vmax.f32 %v1544_v59, 0.0  ;;  %v936_v59 = vunpack.c.l.b16 %v1818_v54 }
  0xfb   : > { %v1204_v62 = vpop.f32.mrf.mxu2  ;;  %v1405_v63 = vpop.f32.mrf.mxu3 }
  0xfc   : > { %v1594_v0 = vpack.c.bf16 %v1569_v60, %v1569_v60  ;;  %v1491_v1 = vmax.f32 %v1204_v62, %v1405_v63  ;;  %v804_v2 = vpop.f32.mrf.mxu0  ;;  %v1005_v3 = vpop.f32.mrf.mxu1  ;;  %v1137_v60 = vunpack.c.l.b16 %v1904_v55  ;;  %v1338_v62 = vunpack.c.l.b16 %v1990_v56 }
  0xfd   : > { %v1467_v12 = vmax.f32 %v804_v2, %v1005_v3  ;;  %v711_v2 = vpack.c.b16 %v698_v58, %v698_v58  ;;  %v949_v3 = vpack.c.b16 %v936_v59, %v936_v59 }
  0xfe   : > { %1620 = vst.msk [vmem:[%s2429_s24 + $0x4] sm:$0xf] %vm1618_vm3, %v1594_v0  ;;  %v1516_v4 = vmax.f32 %v1466_v61, %v1491_v1 }
 0x100   : > { %v1545_v5 = vadd.f32 %v2423_v41, %v1516_v4  ;;  %v1150_v4 = vpack.c.b16 %v1137_v60, %v1137_v60 }
 0x102   : > { %v1570_v6 = vmax.f32 %v1545_v5, 0.0 }
 0x103   : > { %v1206_v7 = vpop.f32.mrf.mxu2  ;;  %v1407_v8 = vpop.f32.mrf.mxu3 }
 0x104   : > { %v1595_v11 = vpack.c.bf16 %v1570_v6, %v1570_v6  ;;  %v1492_v13 = vmax.f32 %v1206_v7, %v1407_v8  ;;  %v807_v14 = vpop.f32.mrf.mxu0  ;;  %v1008_v15 = vpop.f32.mrf.mxu1 }
 0x105   : > { %v1468_v21 = vmax.f32 %v807_v14, %v1008_v15 }
 0x106   : > { %1621 = vst.msk [vmem:[%s2429_s24 + $0x8] sm:$0xf] %vm1618_vm3, %v1595_v11  ;;  %v1517_v18 = vmax.f32 %v1467_v12, %v1492_v13 }
 0x107   : > { %1791 = vmatmul.msk.bf16.gmra.mxu0 %vm741_vm2, %v2070_v9  ;;  %1877 = vmatmul.msk.bf16.gmra.mxu1 %vm741_vm2, %v2082_v10  ;;  %v1351_v10 = vpack.c.b16 %v1338_v62, %v1338_v62 }
 0x108   : > { %v1546_v19 = vadd.f32 %v2423_v41, %v1517_v18  ;;  %1963 = vmatmul.msk.bf16.gmra.mxu2 %vm741_vm2, %v2094_v16  ;;  %2049 = vmatmul.msk.bf16.gmra.mxu3 %vm741_vm2, %v2106_v17 }
 0x10a   : > { %v1571_v20 = vmax.f32 %v1546_v19, 0.0 }
 0x10b   : > { %v1209_v22 = vpop.f32.mrf.mxu2  ;;  %v1410_v23 = vpop.f32.mrf.mxu3 }
 0x10c   : > { %v1596_v24 = vpack.c.bf16 %v1571_v20, %v1571_v20  ;;  %v1493_v25 = vmax.f32 %v1209_v22, %v1410_v23  ;;  %v809_v26 = vpop.f32.mrf.mxu0  ;;  %v1010_v27 = vpop.f32.mrf.mxu1 }
 0x10d   : > { %v1469_v36 = vmax.f32 %v809_v26, %v1010_v27 }
 0x10e   : > { %1622 = vst.msk [vmem:[%s2429_s24 + $0xc] sm:$0xf] %vm1618_vm3, %v1596_v24  ;;  %v1518_v28 = vmax.f32 %v1468_v21, %v1493_v25 }
 0x110   : > { %v1547_v29 = vadd.f32 %v2423_v41, %v1518_v28 }
 0x112   : > { %v1572_v30 = vmax.f32 %v1547_v29, 0.0 }
 0x113   : > { %v1211_v31 = vpop.f32.mrf.mxu2  ;;  %v1412_v32 = vpop.f32.mrf.mxu3 }
 0x114   : > { %v1597_v35 = vpack.c.bf16 %v1572_v30, %v1572_v30  ;;  %v1494_v37 = vmax.f32 %v1211_v31, %v1412_v32  ;;  %v812_v38 = vpop.f32.mrf.mxu0  ;;  %v1013_v39 = vpop.f32.mrf.mxu1 }
 0x115   : > { %v1470_v46 = vmax.f32 %v812_v38, %v1013_v39 }
 0x116   : > { %1623 = vst.msk [vmem:[%s2429_s24 + $0x10] sm:$0xf] %vm1618_vm3, %v1597_v35  ;;  %v1519_v43 = vmax.f32 %v1469_v36, %v1494_v37 }
 0x117   : > { %1792 = vmatmul.msk.bf16.gmra.mxu0 %vm741_vm2, %v2071_v33  ;;  %1878 = vmatmul.msk.bf16.gmra.mxu1 %vm741_vm2, %v2083_v34 }
 0x118   : > { %v1548_v44 = vadd.f32 %v2423_v41, %v1519_v43  ;;  %1964 = vmatmul.msk.bf16.gmra.mxu2 %vm741_vm2, %v2095_v40  ;;  %2050 = vmatmul.msk.bf16.gmra.mxu3 %vm741_vm2, %v2107_v42 }
 0x11a   : > { %v1573_v45 = vmax.f32 %v1548_v44, 0.0 }
 0x11b   : > { %v1214_v47 = vpop.f32.mrf.mxu2  ;;  %v1415_v48 = vpop.f32.mrf.mxu3 }
 0x11c   : > { %v1598_v49 = vpack.c.bf16 %v1573_v45, %v1573_v45  ;;  %v1495_v50 = vmax.f32 %v1214_v47, %v1415_v48  ;;  %v814_v51 = vpop.f32.mrf.mxu0  ;;  %v1015_v52 = vpop.f32.mrf.mxu1 }
 0x11d   : > { %v1471_v6 = vmax.f32 %v814_v51, %v1015_v52 }
 0x11e   : > { %1624 = vst.msk [vmem:[%s2429_s24 + $0x14] sm:$0xf] %vm1618_vm3, %v1598_v49  ;;  %v1520_v57 = vmax.f32 %v1470_v46, %v1495_v50 }
 0x120   : > { %v1549_v61 = vadd.f32 %v2423_v41, %v1520_v57 }
 0x122   : > { %v1574_v63 = vmax.f32 %v1549_v61, 0.0 }
 0x123   : > { %v1216_v0 = vpop.f32.mrf.mxu2  ;;  %v1417_v1 = vpop.f32.mrf.mxu3 }
 0x124   : > { %v1599_v5 = vpack.c.bf16 %v1574_v63, %v1574_v63  ;;  %v1496_v7 = vmax.f32 %v1216_v0, %v1417_v1  ;;  %v817_v8 = vpop.f32.mrf.mxu0  ;;  %v1018_v9 = vpop.f32.mrf.mxu1 }
 0x125   : > { %v1472_v14 = vmax.f32 %v817_v8, %v1018_v9 }
 0x126   : > { %1625 = vst.msk [vmem:[%s2429_s24 + $0x18] sm:$0xf] %vm1618_vm3, %v1599_v5  ;;  %v1521_v11 = vmax.f32 %v1471_v6, %v1496_v7 }
 0x127   : > { %1793 = vmatmul.msk.bf16.gmra.mxu0 %vm741_vm2, %v711_v2  ;;  %1879 = vmatmul.msk.bf16.gmra.mxu1 %vm741_vm2, %v949_v3 }
 0x128   : > { %v1550_v12 = vadd.f32 %v2423_v41, %v1521_v11  ;;  %1965 = vmatmul.msk.bf16.gmra.mxu2 %vm741_vm2, %v1150_v4  ;;  %2051 = vmatmul.msk.bf16.gmra.mxu3 %vm741_vm2, %v1351_v10 }
 0x12a   : > { %v1575_v13 = vmax.f32 %v1550_v12, 0.0 }
 0x12b   : > { %v1219_v15 = vpop.f32.mrf.mxu2  ;;  %v1420_v16 = vpop.f32.mrf.mxu3 }
 0x12c   : > { %v1600_v17 = vpack.c.bf16 %v1575_v13, %v1575_v13  ;;  %v1497_v18 = vmax.f32 %v1219_v15, %v1420_v16  ;;  %v819_v19 = vpop.f32.mrf.mxu0  ;;  %v1020_v20 = vpop.f32.mrf.mxu1 }
 0x12d   : > { %v1473_v27 = vmax.f32 %v819_v19, %v1020_v20 }
 0x12e   : > { %1626 = vst.msk [vmem:[%s2429_s24 + $0x1c] sm:$0xf] %vm1618_vm3, %v1600_v17  ;;  %v1522_v21 = vmax.f32 %v1472_v14, %v1497_v18 }
 0x130   : > { %v1551_v22 = vadd.f32 %v2423_v41, %v1522_v21 }
 0x132   : > { %v1576_v23 = vmax.f32 %v1551_v22, 0.0 }
 0x133   : > { %v1221_v24 = vpop.f32.mrf.mxu2  ;;  %v1422_v25 = vpop.f32.mrf.mxu3 }
 0x134   : > { %v1601_v26 = vpack.c.bf16 %v1576_v23, %v1576_v23  ;;  %v1498_v28 = vmax.f32 %v1221_v24, %v1422_v25  ;;  %v822_v29 = vpop.f32.mrf.mxu0  ;;  %v1023_v30 = vpop.f32.mrf.mxu1 }
 0x135   : > { %v1474_v34 = vmax.f32 %v822_v29, %v1023_v30 }
 0x136   : > { %1627 = vst.msk [vmem:[%s2429_s24 + $0x20] sm:$0xf] %vm1618_vm3, %v1601_v26  ;;  %v1523_v31 = vmax.f32 %v1473_v27, %v1498_v28 }
 0x138   : > { %v1552_v32 = vadd.f32 %v2423_v41, %v1523_v31 }
 0x13a   : > { %v1577_v33 = vmax.f32 %v1552_v32, 0.0 }
 0x13b   : > { %v1224_v35 = vpop.f32.mrf.mxu2  ;;  %v1425_v36 = vpop.f32.mrf.mxu3 }
 0x13c   : > { %v1602_v37 = vpack.c.bf16 %v1577_v33, %v1577_v33  ;;  %v1499_v38 = vmax.f32 %v1224_v35, %v1425_v36  ;;  %v824_v39 = vpop.f32.mrf.mxu0  ;;  %v1025_v40 = vpop.f32.mrf.mxu1 }
 0x13d   : > { %v1475_v48 = vmax.f32 %v824_v39, %v1025_v40 }
 0x13e   : > { %1628 = vst.msk [vmem:[%s2429_s24 + $0x24] sm:$0xf] %vm1618_vm3, %v1602_v37  ;;  %v1524_v42 = vmax.f32 %v1474_v34, %v1499_v38 }
 0x140   : > { %v1553_v43 = vadd.f32 %v2423_v41, %v1524_v42 }
 0x142   : > { %v1578_v44 = vmax.f32 %v1553_v43, 0.0 }
 0x143   : > { %v1226_v45 = vpop.f32.mrf.mxu2  ;;  %v1427_v46 = vpop.f32.mrf.mxu3 }
 0x144   : > { %v1603_v47 = vpack.c.bf16 %v1578_v44, %v1578_v44  ;;  %v1500_v49 = vmax.f32 %v1226_v45, %v1427_v46  ;;  %v827_v50 = vpop.f32.mrf.mxu0  ;;  %v1028_v51 = vpop.f32.mrf.mxu1 }
 0x145   : > { %v1476_v55 = vmax.f32 %v827_v50, %v1028_v51 }
 0x146   : > { %1629 = vst.msk [vmem:[%s2429_s24 + $0x28] sm:$0xf] %vm1618_vm3, %v1603_v47  ;;  %v1525_v52 = vmax.f32 %v1475_v48, %v1500_v49 }
 0x148   : > { %v1554_v53 = vadd.f32 %v2423_v41, %v1525_v52 }
 0x14a   : > { %v1579_v54 = vmax.f32 %v1554_v53, 0.0 }
 0x14b   : > { %v1229_v56 = vpop.f32.mrf.mxu2  ;;  %v1430_v57 = vpop.f32.mrf.mxu3 }
 0x14c   : > { %v1604_v58 = vpack.c.bf16 %v1579_v54, %v1579_v54  ;;  %v1501_v59 = vmax.f32 %v1229_v56, %v1430_v57  ;;  %v829_v60 = vpop.f32.mrf.mxu0  ;;  %v1030_v61 = vpop.f32.mrf.mxu1 }
 0x14d   : > { %v1477_v4 = vmax.f32 %v829_v60, %v1030_v61 }
 0x14e   : > { %1630 = vst.msk [vmem:[%s2429_s24 + $0x2c] sm:$0xf] %vm1618_vm3, %v1604_v58  ;;  %v1526_v62 = vmax.f32 %v1476_v55, %v1501_v59 }
 0x150   : > { %v1555_v63 = vadd.f32 %v2423_v41, %v1526_v62 }
 0x152   : > { %v1580_v0 = vmax.f32 %v1555_v63, 0.0 }
 0x153   : > { %v1231_v1 = vpop.f32.mrf.mxu2  ;;  %v1432_v2 = vpop.f32.mrf.mxu3 }
 0x154   : > { %v1605_v3 = vpack.c.bf16 %v1580_v0, %v1580_v0  ;;  %v1502_v5 = vmax.f32 %v1231_v1, %v1432_v2  ;;  %v832_v6 = vpop.f32.mrf.mxu0  ;;  %v1033_v7 = vpop.f32.mrf.mxu1 }
 0x155   : > { %v1478_v11 = vmax.f32 %v832_v6, %v1033_v7 }
 0x156   : > { %1631 = vst.msk [vmem:[%s2429_s24 + $0x30] sm:$0xf] %vm1618_vm3, %v1605_v3  ;;  %v1527_v8 = vmax.f32 %v1477_v4, %v1502_v5 }
 0x158   : > { %v1556_v9 = vadd.f32 %v2423_v41, %v1527_v8 }
 0x15a   : > { %v1581_v10 = vmax.f32 %v1556_v9, 0.0 }
 0x15b   : > { %v1234_v12 = vpop.f32.mrf.mxu2  ;;  %v1435_v13 = vpop.f32.mrf.mxu3 }
 0x15c   : > { %v1606_v14 = vpack.c.bf16 %v1581_v10, %v1581_v10  ;;  %v1503_v15 = vmax.f32 %v1234_v12, %v1435_v13  ;;  %v834_v16 = vpop.f32.mrf.mxu0  ;;  %v1035_v17 = vpop.f32.mrf.mxu1 }
 0x15d   : > { %v1479_v24 = vmax.f32 %v834_v16, %v1035_v17 }
 0x15e   : > { %1632 = vst.msk [vmem:[%s2429_s24 + $0x34] sm:$0xf] %vm1618_vm3, %v1606_v14  ;;  %v1528_v18 = vmax.f32 %v1478_v11, %v1503_v15 }
 0x160   : > { %v1557_v19 = vadd.f32 %v2423_v41, %v1528_v18 }
 0x162   : > { %v1582_v20 = vmax.f32 %v1557_v19, 0.0 }
 0x163   : > { %v1236_v21 = vpop.f32.mrf.mxu2  ;;  %v1437_v22 = vpop.f32.mrf.mxu3 }
 0x164   : > { %v1607_v23 = vpack.c.bf16 %v1582_v20, %v1582_v20  ;;  %v1504_v25 = vmax.f32 %v1236_v21, %v1437_v22  ;;  %v837_v26 = vpop.f32.mrf.mxu0  ;;  %v1038_v27 = vpop.f32.mrf.mxu1 }
 0x165   : > { %v1480_v31 = vmax.f32 %v837_v26, %v1038_v27 }
 0x166   : > { %1633 = vst.msk [vmem:[%s2429_s24 + $0x38] sm:$0xf] %vm1618_vm3, %v1607_v23  ;;  %v1529_v28 = vmax.f32 %v1479_v24, %v1504_v25 }
 0x168   : > { %v1558_v29 = vadd.f32 %v2423_v41, %v1529_v28 }
 0x16a   : > { %v1583_v30 = vmax.f32 %v1558_v29, 0.0 }
 0x16b   : > { %v1239_v32 = vpop.f32.mrf.mxu2  ;;  %v1440_v33 = vpop.f32.mrf.mxu3 }
 0x16c   : > { %v1608_v34 = vpack.c.bf16 %v1583_v30, %v1583_v30  ;;  %v1505_v35 = vmax.f32 %v1239_v32, %v1440_v33  ;;  %v839_v36 = vpop.f32.mrf.mxu0  ;;  %v1040_v37 = vpop.f32.mrf.mxu1 }
 0x16d   : > { %v1481_v45 = vmax.f32 %v839_v36, %v1040_v37 }
 0x16e   : > { %1634 = vst.msk [vmem:[%s2429_s24 + $0x3c] sm:$0xf] %vm1618_vm3, %v1608_v34  ;;  %v1530_v38 = vmax.f32 %v1480_v31, %v1505_v35 }
 0x170   : > { %v1559_v39 = vadd.f32 %v2423_v41, %v1530_v38 }
 0x172   : > { %v1584_v40 = vmax.f32 %v1559_v39, 0.0 }
 0x173   : > { %v1241_v42 = vpop.f32.mrf.mxu2  ;;  %v1442_v43 = vpop.f32.mrf.mxu3 }
 0x174   : > { %v1609_v44 = vpack.c.bf16 %v1584_v40, %v1584_v40  ;;  %v1506_v46 = vmax.f32 %v1241_v42, %v1442_v43  ;;  %v842_v47 = vpop.f32.mrf.mxu0  ;;  %v1043_v48 = vpop.f32.mrf.mxu1 }
 0x175   : > { %v1482_v52 = vmax.f32 %v842_v47, %v1043_v48 }
 0x176   : > { %1635 = vst.msk [vmem:[%s2429_s24 + $0x40] sm:$0xf] %vm1618_vm3, %v1609_v44  ;;  %v1531_v49 = vmax.f32 %v1481_v45, %v1506_v46 }
 0x178   : > { %v1560_v50 = vadd.f32 %v2423_v41, %v1531_v49 }
 0x17a   : > { %v1585_v51 = vmax.f32 %v1560_v50, 0.0 }
 0x17b   : > { %v1244_v53 = vpop.f32.mrf.mxu2  ;;  %v1445_v54 = vpop.f32.mrf.mxu3 }
 0x17c   : > { %v1610_v55 = vpack.c.bf16 %v1585_v51, %v1585_v51  ;;  %v1507_v56 = vmax.f32 %v1244_v53, %v1445_v54  ;;  %v844_v57 = vpop.f32.mrf.mxu0  ;;  %v1045_v58 = vpop.f32.mrf.mxu1 }
 0x17d   : > { %v1483_v1 = vmax.f32 %v844_v57, %v1045_v58 }
 0x17e   : > { %1636 = vst.msk [vmem:[%s2429_s24 + $0x44] sm:$0xf] %vm1618_vm3, %v1610_v55  ;;  %v1532_v59 = vmax.f32 %v1482_v52, %v1507_v56 }
 0x180   : > { %v1561_v60 = vadd.f32 %v2423_v41, %v1532_v59 }
 0x182   : > { %v1586_v61 = vmax.f32 %v1561_v60, 0.0 }
 0x183   : > { %v1246_v62 = vpop.f32.mrf.mxu2  ;;  %v1447_v63 = vpop.f32.mrf.mxu3 }
 0x184   : > { %v1611_v0 = vpack.c.bf16 %v1586_v61, %v1586_v61  ;;  %v1508_v2 = vmax.f32 %v1246_v62, %v1447_v63  ;;  %v847_v3 = vpop.f32.mrf.mxu0  ;;  %v1048_v4 = vpop.f32.mrf.mxu1 }
 0x185   : > { %v1484_v8 = vmax.f32 %v847_v3, %v1048_v4 }
 0x186   : > { %1637 = vst.msk [vmem:[%s2429_s24 + $0x48] sm:$0xf] %vm1618_vm3, %v1611_v0  ;;  %v1533_v5 = vmax.f32 %v1483_v1, %v1508_v2 }
 0x188   : > { %v1562_v6 = vadd.f32 %v2423_v41, %v1533_v5 }
 0x18a   : > { %v1587_v7 = vmax.f32 %v1562_v6, 0.0 }
 0x18b   : > { %v1249_v9 = vpop.f32.mrf.mxu2  ;;  %v1450_v10 = vpop.f32.mrf.mxu3 }
 0x18c   : > { %v1612_v11 = vpack.c.bf16 %v1587_v7, %v1587_v7  ;;  %v1509_v12 = vmax.f32 %v1249_v9, %v1450_v10  ;;  %v849_v13 = vpop.f32.mrf.mxu0  ;;  %v1050_v14 = vpop.f32.mrf.mxu1 }
 0x18d   : > { %v1485_v21 = vmax.f32 %v849_v13, %v1050_v14 }
 0x18e   : > { %1638 = vst.msk [vmem:[%s2429_s24 + $0x4c] sm:$0xf] %vm1618_vm3, %v1612_v11  ;;  %v1534_v15 = vmax.f32 %v1484_v8, %v1509_v12 }
 0x190   : > { %v1563_v16 = vadd.f32 %v2423_v41, %v1534_v15 }
 0x192   : > { %v1588_v17 = vmax.f32 %v1563_v16, 0.0 }
 0x193   : > { %v1251_v18 = vpop.f32.mrf.mxu2  ;;  %v1452_v19 = vpop.f32.mrf.mxu3 }
 0x194   : > { %v1613_v20 = vpack.c.bf16 %v1588_v17, %v1588_v17  ;;  %v1510_v22 = vmax.f32 %v1251_v18, %v1452_v19  ;;  %v852_v23 = vpop.f32.mrf.mxu0  ;;  %v1053_v24 = vpop.f32.mrf.mxu1 }
 0x195   : > { %v1486_v28 = vmax.f32 %v852_v23, %v1053_v24 }
 0x196   : > { %1639 = vst.msk [vmem:[%s2429_s24 + $0x50] sm:$0xf] %vm1618_vm3, %v1613_v20  ;;  %v1535_v25 = vmax.f32 %v1485_v21, %v1510_v22 }
 0x198   : > { %v1564_v26 = vadd.f32 %v2423_v41, %v1535_v25 }
 0x19a   : > { %v1589_v27 = vmax.f32 %v1564_v26, 0.0 }
 0x19b   : > { %v1254_v29 = vpop.f32.mrf.mxu2  ;;  %v1455_v30 = vpop.f32.mrf.mxu3 }
 0x19c   : > { %v1614_v31 = vpack.c.bf16 %v1589_v27, %v1589_v27  ;;  %v1511_v32 = vmax.f32 %v1254_v29, %v1455_v30  ;;  %v854_v33 = vpop.f32.mrf.mxu0  ;;  %v1055_v34 = vpop.f32.mrf.mxu1 }
 0x19d   : > { %v1487_v42 = vmax.f32 %v854_v33, %v1055_v34 }
 0x19e   : > { %1640 = vst.msk [vmem:[%s2429_s24 + $0x54] sm:$0xf] %vm1618_vm3, %v1614_v31  ;;  %v1536_v35 = vmax.f32 %v1486_v28, %v1511_v32 }
 0x1a0   : > { %v1565_v36 = vadd.f32 %v2423_v41, %v1536_v35 }
 0x1a2   : > { %v1590_v37 = vmax.f32 %v1565_v36, 0.0 }
 0x1a3   : > { %v1256_v38 = vpop.f32.mrf.mxu2  ;;  %v1457_v39 = vpop.f32.mrf.mxu3 }
 0x1a4   : > { %v1615_v40 = vpack.c.bf16 %v1590_v37, %v1590_v37  ;;  %v1512_v43 = vmax.f32 %v1256_v38, %v1457_v39  ;;  %v857_v44 = vpop.f32.mrf.mxu0  ;;  %v1058_v45 = vpop.f32.mrf.mxu1 }
 0x1a5   : > { %v1488_v49 = vmax.f32 %v857_v44, %v1058_v45 }
 0x1a6   : > { %1641 = vst.msk [vmem:[%s2429_s24 + $0x58] sm:$0xf] %vm1618_vm3, %v1615_v40  ;;  %v1537_v46 = vmax.f32 %v1487_v42, %v1512_v43 }
 0x1a8   : > { %v1566_v47 = vadd.f32 %v2423_v41, %v1537_v46 }
 0x1aa   : > { %v1591_v48 = vmax.f32 %v1566_v47, 0.0 }
 0x1ab   : > { %v1259_v50 = vpop.f32.mrf.mxu2  ;;  %v1460_v51 = vpop.f32.mrf.mxu3 }
 0x1ac   : > { %v1616_v52 = vpack.c.bf16 %v1591_v48, %v1591_v48  ;;  %v1513_v53 = vmax.f32 %v1259_v50, %v1460_v51  ;;  %v859_v54 = vpop.f32.mrf.mxu0  ;;  %v1060_v55 = vpop.f32.mrf.mxu1 }
 0x1ae   : > { %1642 = vst.msk [vmem:[%s2429_s24 + $0x5c] sm:$0xf] %vm1618_vm3, %v1616_v52  ;;  %v1538_v56 = vmax.f32 %v1488_v49, %v1513_v53 }
 0x1b0   : > { %v1567_v57 = vadd.f32 %v2423_v41, %v1538_v56 }
 0x1b2   : > { %v1592_v58 = vmax.f32 %v1567_v57, 0.0 }
 0x1b3   : > { %v1261_v59 = vpop.f32.mrf.mxu2  ;;  %v1462_v60 = vpop.f32.mrf.mxu3 }
 0x1b4   : > { %v1617_v61 = vpack.c.bf16 %v1592_v58, %v1592_v58 }
 0x1b6   : > { %1643 = vst.msk [vmem:[%s2429_s24 + $0x60] sm:$0xf] %vm1618_vm3, %v1617_v61 }
 0x1b7 PF: > { %p10_p9 = scmp.ge.s32.totalorder %s2198_s16, 4   ;;  %s2551_s12 = smov %s2154_s13 }
 0x1b8   : > { %s2552_s13 = smov %s2207_s19  ;;  %s2553_s14 = smov %s2198_s16 }
 0x1b9   :  { %12 = sbr.rel (!%p10_p9) target bundleno = 2 (0x2), region = 111 }

// kernel: net_forward.4
= control target key start
LH: loop header
LB: loop body
LE: loop exit
PB: predicated region body
PF: predicated region fallthrough
CT: control target
= control target key end

     0   :  { %s983_s12 = smov 0   ;;  %s985_s13 = smov 0   ;;  %s1201_s0 = inlined_call_operand.vmem [shape: bf16[4,64,200], index: 0, kind: input, shape index: {}]   ;;  %s1202_s1 = inlined_call_operand.vmem [shape: bf16[200,128], index: 1, kind: input, shape index: {}]   ;;  %s1203_s2 = inlined_call_operand.vmem [shape: f32[1,128], index: 2, kind: input, shape index: {}]   ;;  %s1204_s3 = inlined_call_operand.vmem [shape: bf16[64,16], index: 3, kind: output, shape index: {}]  }
   0x1   :  { %s987_s14 = smov 0  }
   0x2 LB: > { %s738_s15 = sadd.s32 4294967295, %s961_s14   ;;  %s1000_s16 = sadd.s32 1, %s961_s14   ;;  %s961_s14 = sphi %s987_s14, %s1207_s14   ;;  %s957_s13 = sphi %s985_s13, %s1206_s13   ;;  %s953_s12 = sphi %s983_s12, %s1205_s12  }
   0x3   : > { %s17_s17 = ssub.s32 %s961_s14, %s1000_s16  ;;  %s20_s18 = sadd.s32 1, %s957_s13 }
   0x4   : > { %p18_p0 = scmp.eq.s32.totalorder %s17_s17, 0  ;;  %p27_p1 = scmp.ne.s32.totalorder %s957_s13, %s953_s12 }
   0x5   : > { %p28_p2 = scmp.eq.s32.totalorder %s961_s14, 0  ;;  %p741_p4 = scmp.ge.s32.totalorder %s961_s14, 2 }
   0x6   : > { %s1009_s19 = scalar_select %p18_p0, %s957_s13, %s20_s18  }
   0x7   : > { %p29_p3 = por %p28_p2, %p27_p1  ;;  %127 = sbr.rel (%p741_p4) target bundleno = 32 (0x20), region = 24 }
   0xc   : > { %130 = sbr.rel (!%p29_p3) target bundleno = 32 (0x20), region = 28  ;;  %s132_s20 = sand.u32 (%p29_p3), 1, %s957_s13  }
   0xd   : > { %s885_s21 = sshll.u32 (%p29_p3), %s961_s14, 5  ;;  %s742_s22 = sshll.u32 (%p29_p3), %s132_s20, 7 }
   0xe   : > { %s1017_s25 = scalar_lea.vmem (%p29_p3), %s1201_s0, %s885_s21  ;;  %s134_s26 = scalar_lea.vmem (%p29_p3), [#allocation2], %s742_s22 }
   0xf   : > { %v197_v0 = vld [vmem:[%s1017_s25] sm:$0xff] (%p29_p3)  ;;  %v199_v1 = vld [vmem:[%s1017_s25 + $0x8] sm:$0xff] (%p29_p3)  ;;  %v201_v2 = vld [vmem:[%s1017_s25 + $0x10] sm:$0xff] (%p29_p3) }
  0x10   : > { %198 = vst [vmem:[%s134_s26] sm:$0xff] (%p29_p3), %v197_v0  ;;  %v203_v3 = vld [vmem:[%s1017_s25 + $0x18] sm:$0xff] (%p29_p3)  ;;  %v205_v4 = vld [vmem:[%s1017_s25 + $0x40] sm:$0xff] (%p29_p3)  ;;  %v207_v5 = vld [vmem:[%s1017_s25 + $0x48] sm:$0xff] (%p29_p3) }
  0x11   : > { %200 = vst [vmem:[%s134_s26 + $0x8] sm:$0xff] %v199_v1  ;;  %v209_v6 = vld [vmem:[%s1017_s25 + $0x50] sm:$0xff]  ;;  %v211_v7 = vld [vmem:[%s1017_s25 + $0x58] sm:$0xff]  ;;  %v213_v8 = vld [vmem:[%s1017_s25 + $0x80] sm:$0xff] }
  0x12   : > { %202 = vst [vmem:[%s134_s26 + $0x10] sm:$0xff] %v201_v2  ;;  %v215_v9 = vld [vmem:[%s1017_s25 + $0x88] sm:$0xff]  ;;  %v217_v10 = vld [vmem:[%s1017_s25 + $0x90] sm:$0xff]  ;;  %v219_v11 = vld [vmem:[%s1017_s25 + $0x98] sm:$0xff] }
  0x13   : > { %204 = vst [vmem:[%s134_s26 + $0x18] sm:$0xff] %v203_v3  ;;  %v221_v12 = vld [vmem:[%s1017_s25 + $0xc0] sm:$0xff]  ;;  %v223_v13 = vld [vmem:[%s1017_s25 + $0xc8] sm:$0xff]  ;;  %v225_v14 = vld [vmem:[%s1017_s25 + $0xd0] sm:$0xff] }
  0x14   : > { %206 = vst [vmem:[%s134_s26 + $0x20] sm:$0xff] %v205_v4  ;;  %v227_v15 = vld [vmem:[%s1017_s25 + $0xd8] sm:$0xff] }
  0x15   : > { %208 = vst [vmem:[%s134_s26 + $0x28] sm:$0xff] %v207_v5 }
  0x16   : > { %210 = vst [vmem:[%s134_s26 + $0x30] sm:$0xff] %v209_v6 }
  0x17   : > { %212 = vst [vmem:[%s134_s26 + $0x38] sm:$0xff] %v211_v7 }
  0x18   : > { %214 = vst [vmem:[%s134_s26 + $0x40] sm:$0xff] %v213_v8 }
  0x19   : > { %216 = vst [vmem:[%s134_s26 + $0x48] sm:$0xff] %v215_v9 }
  0x1a   : > { %218 = vst [vmem:[%s134_s26 + $0x50] sm:$0xff] %v217_v10 }
  0x1b   : > { %220 = vst [vmem:[%s134_s26 + $0x58] sm:$0xff] %v219_v11 }
  0x1c   : > { %222 = vst [vmem:[%s134_s26 + $0x60] sm:$0xff] %v221_v12 }
  0x1d   : > { %224 = vst [vmem:[%s134_s26 + $0x68] sm:$0xff] %v223_v13 }
  0x1e   : > { %226 = vst [vmem:[%s134_s26 + $0x70] sm:$0xff] %v225_v14 }
  0x1f   : > { %228 = vst [vmem:[%s134_s26 + $0x78] sm:$0xff] %v227_v15 }
  0x20 PF: > { %p746_p5 = scmp.ge.s32.totalorder %s961_s14, 1  ;;  %p233_p6 = scmp.lt.s32.totalorder %s961_s14, 3 }
  0x22   : > { %p234_p7 = pnand %p746_p5, %p233_p6 }
  0x23   : > { %s240_s17 = sand.u32 (!%p234_p7), 1, %s953_s12   ;;  %s748_s7 = sshll.u32 (!%p234_p7), %s738_s15, 2 }
  0x24   : > { %237 = sbr.rel (%p234_p7) target bundleno = 278 (0x116), region = 66  ;;  %s747_s21 = sshll.u32 (!%p234_p7), %s240_s17, 7 }
  0x25   : > { %s1099_s29 = scalar_lea.vmem (!%p234_p7), [#allocation2], %s747_s21  ;;  %p265_p8 = scmp.lt.s32.totalorder (!%p234_p7), %s748_s7, 7 }
  0x29   : > { %v1040_v16 = vld [vmem:[%s1202_s1 + $0x38] sm:$0xff]  ;;  %v295_v17 = vld [vmem:[%s1202_s1 + $0x60] sm:$0xf]  ;;  %v1050_v19 = vld [vmem:[%s1202_s1 + $0x30] sm:$0xff]  ;;  %vm400_vm0 = vcmask 1043456   ;;  %vm393_vm1 = vcmask 588800  }
  0x2a   : > { %v367_v18 = vunpack.c.l.b16 %v295_v17  ;;  %404 = vmatpush.bf16.msra.mxu0 %v1040_v16  ;;  %471 = vmatpush.bf16.msra.mxu2 %v1040_v16  ;;  %v1057_v22 = vld [vmem:[%s1202_s1 + $0x28] sm:$0xff]  ;;  %v897_v23 = vld [vmem:[%s1202_s1 + $0x58] sm:$0xff]  ;;  %v1067_v24 = vld [vmem:[%s1202_s1 + $0x20] sm:$0xff]  ;;  %s1209_s7 = smov (!%p265_p8, %s748_s7), 7  ;;  %vm671_vm2 = vcmask 125952  }
  0x2b   : > { %v896_v25 = vld [vmem:[%s1202_s1 + $0x50] sm:$0xff]  ;;  %v1078_v26 = vld [vmem:[%s1202_s1 + $0x18] sm:$0xff]  ;;  %v1083_v27 = vld [vmem:[%s1202_s1 + $0x48] sm:$0xff]  ;;  %s749_s14 = sshll.u32 %s1209_s7, 2 }
  0x2c   : > { %v380_v20 = vpack.c.b16 %v367_v18, %v367_v18  ;;  %v1090_v28 = vld [vmem:[%s1202_s1 + $0x10] sm:$0xff]  ;;  %v1096_v29 = vld [vmem:[%s1202_s1 + $0x40] sm:$0xff]  ;;  %v824_v31 = vld [vmem:[%s1099_s29 + $0x28] sm:$0xf0]  ;;  %s1181_s11 = scalar_lea.vmem %s1204_s3, %s749_s14 }
  0x2d   : > { %v902_v30 = vld [vmem:[%s1099_s29 + $0x24] sm:$0xf]  ;;  %v754_v33 = vld [vmem:[%s1099_s29 + $0x8] sm:$0xf0]  ;;  %v752_v38 = vld [vmem:[%s1099_s29] sm:$0xf] }
  0x2e   : > { %v402_v21 = vsel %vm400_vm0, %v380_v20, 0  ;;  %405 = vmatpush.bf16.msra.mxu0 %v1050_v19  ;;  %472 = vmatpush.bf16.msra.mxu2 %v1050_v19  ;;  %v898_v32 = vld [vmem:[%s1099_s29 + $0x4] sm:$0xf]  ;;  %v827_v34 = vor.u32 %v902_v30, %v824_v31  ;;  %v1110_v35 = vld [vmem:[%s1202_s1 + $0x8] sm:$0xff]  ;;  %v822_v40 = vld [vmem:[%s1099_s29 + $0x20] sm:$0xf] }
  0x2f   : > { %493 = vmatpush.bf16.msra.mxu3 %v402_v21  ;;  %426 = vmatpush.bf16.msra.mxu1 %v402_v21  ;;  %v757_v36 = vor.u32 %v898_v32, %v754_v33  ;;  %v886_v37 = vld [vmem:[%s1202_s1] sm:$0xff]  ;;  %v899_v39 = vld [vmem:[%s1099_s29 + $0x4] sm:$0xf0]  ;;  %v904_v44 = vld [vmem:[%s1099_s29 + $0x34] sm:$0xf] }
  0x30   : > { %v903_v41 = vld [vmem:[%s1099_s29 + $0x24] sm:$0xf0]  ;;  %v753_v42 = vor.u32 %v899_v39, %v752_v38  ;;  %v832_v45 = vld [vmem:[%s1099_s29 + $0x38] sm:$0xf0]  ;;  %v900_v46 = vld [vmem:[%s1099_s29 + $0x14] sm:$0xf] }
  0x31   : > { %v823_v43 = vor.u32 %v903_v41, %v822_v40  ;;  %v762_v47 = vld [vmem:[%s1099_s29 + $0x18] sm:$0xf0]  ;;  %v835_v48 = vor.u32 %v904_v44, %v832_v45  ;;  %v760_v50 = vld [vmem:[%s1099_s29 + $0x10] sm:$0xf]  ;;  %v901_v51 = vld [vmem:[%s1099_s29 + $0x14] sm:$0xf0] }
  0x32   : > { %406 = vmatpush.bf16.msra.mxu0 %v1057_v22  ;;  %473 = vmatpush.bf16.msra.mxu2 %v1057_v22  ;;  %v765_v49 = vor.u32 %v900_v46, %v762_v47  ;;  %v830_v52 = vld [vmem:[%s1099_s29 + $0x30] sm:$0xf]  ;;  %v905_v53 = vld [vmem:[%s1099_s29 + $0x34] sm:$0xf0]  ;;  %v761_v54 = vor.u32 %v901_v51, %v760_v50  ;;  %v906_v56 = vld [vmem:[%s1099_s29 + $0x44] sm:$0xf] }
  0x33   : > { %494 = vmatpush.bf16.msra.mxu3 %v897_v23  ;;  %427 = vmatpush.bf16.msra.mxu1 %v897_v23  ;;  %v831_v55 = vor.u32 %v905_v53, %v830_v52  ;;  %v846_v57 = vld [vmem:[%s1099_s29 + $0x48] sm:$0xf0]  ;;  %v844_v58 = vld [vmem:[%s1099_s29 + $0x40] sm:$0xf]  ;;  %v907_v59 = vld [vmem:[%s1099_s29 + $0x44] sm:$0xf0] }
  0x34   : > { %v849_v60 = vor.u32 %v906_v56, %v846_v57  ;;  %v845_v61 = vor.u32 %v907_v59, %v844_v58  ;;  %v866_v62 = vld [vmem:[%s1099_s29 + $0x60] sm:$0xf]  ;;  %v911_v63 = vld [vmem:[%s1099_s29 + $0x64] sm:$0xf0]  ;;  %v910_v0 = vld [vmem:[%s1099_s29 + $0x64] sm:$0xf] }
  0x35   : > { %v868_v1 = vld [vmem:[%s1099_s29 + $0x68] sm:$0xf0]  ;;  %v867_v2 = vor.u32 %v911_v63, %v866_v62  ;;  %v908_v4 = vld [vmem:[%s1099_s29 + $0x54] sm:$0xf]  ;;  %v854_v5 = vld [vmem:[%s1099_s29 + $0x58] sm:$0xf0] }
  0x36   : > { %407 = vmatpush.bf16.msra.mxu0 %v1067_v24  ;;  %474 = vmatpush.bf16.msra.mxu2 %v1067_v24  ;;  %v871_v3 = vor.u32 %v910_v0, %v868_v1  ;;  %v852_v6 = vld [vmem:[%s1099_s29 + $0x50] sm:$0xf]  ;;  %v909_v7 = vld [vmem:[%s1099_s29 + $0x54] sm:$0xf0]  ;;  %v857_v8 = vor.u32 %v908_v4, %v854_v5  ;;  %v912_v12 = vld [vmem:[%s1099_s29 + $0x74] sm:$0xf] }
  0x37   : > { %495 = vmatpush.bf16.msra.mxu3 %v896_v25  ;;  %428 = vmatpush.bf16.msra.mxu1 %v896_v25  ;;  %v853_v9 = vor.u32 %v909_v7, %v852_v6  ;;  %v874_v10 = vld [vmem:[%s1099_s29 + $0x70] sm:$0xf]  ;;  %v913_v11 = vld [vmem:[%s1099_s29 + $0x74] sm:$0xf0]  ;;  %v876_v13 = vld [vmem:[%s1099_s29 + $0x78] sm:$0xf0] }
  0x38   : > { %v875_v14 = vor.u32 %v913_v11, %v874_v10  ;;  %v879_v15 = vor.u32 %v912_v12, %v876_v13  ;;  %v938_v44 = vld [vmem:[%s1203_s2] ss:$0 sm:$0xff] }
  0x3a   : > { %408 = vmatpush.bf16.msra.mxu0 %v1078_v26  ;;  %475 = vmatpush.bf16.msra.mxu2 %v1078_v26 }
  0x3b   : > { %496 = vmatpush.bf16.msra.mxu3 %v1083_v27  ;;  %429 = vmatpush.bf16.msra.mxu1 %v1083_v27 }
  0x3e   : > { %409 = vmatpush.bf16.msra.mxu0 %v1090_v28  ;;  %476 = vmatpush.bf16.msra.mxu2 %v1090_v28 }
  0x3f   : > { %497 = vmatpush.bf16.msra.mxu3 %v1096_v29  ;;  %430 = vmatpush.bf16.msra.mxu1 %v1096_v29 }
  0x42   : > { %836 = vmatmul.msk.bf16.vlgmr.msra.gmra.mxu3 %vm393_vm1, %v827_v34  ;;  %410 = vmatpush.bf16.msra.mxu0 %v1110_v35 }
  0x43   : > { %538 = vmatpush.bf16.msrb.mxu1 %v1040_v16  ;;  %560 = vmatpush.bf16.msrb.mxu3 %v402_v21 }
  0x44   : > { %477 = vmatpush.bf16.msra.mxu2 %v1110_v35  ;;  %814 = vmatmul.msk.bf16.vlgmr.msra.gmra.mxu1 %vm393_vm1, %v757_v36 }
  0x46   : > { %411 = vmatpush.bf16.msra.mxu0 %v886_v37 }
  0x47   : > { %539 = vmatpush.bf16.msrb.mxu1 %v1050_v19  ;;  %561 = vmatpush.bf16.msrb.mxu3 %v897_v23 }
  0x48   : > { %478 = vmatpush.bf16.msra.mxu2 %v886_v37 }
  0x49   : > { %412 = vmatmul.bf16.vlgmr.msra.gmra.mxu0 %v753_v42 }
  0x4a   : > { %605 = vmatpush.bf16.msrb.mxu0 %v1040_v16 }
  0x4b   : > { %540 = vmatpush.bf16.msrb.mxu1 %v1057_v22  ;;  %562 = vmatpush.bf16.msrb.mxu3 %v896_v25 }
  0x4c   : > { %627 = vmatpush.bf16.msrb.mxu2 %v402_v21 }
  0x4d   : > { %479 = vmatmul.bf16.vlgmr.msra.gmra.mxu2 %v823_v43 }
  0x4e   : > { %606 = vmatpush.bf16.msrb.mxu0 %v1050_v19 }
  0x4f   : > { %541 = vmatpush.bf16.msrb.mxu1 %v1067_v24  ;;  %563 = vmatpush.bf16.msrb.mxu3 %v1083_v27 }
  0x50   : > { %628 = vmatpush.bf16.msrb.mxu2 %v897_v23 }
  0x52   : > { %607 = vmatpush.bf16.msrb.mxu0 %v1057_v22  ;;  %837 = vmatmul.msk.bf16.gmra.mxu3 %vm393_vm1, %v835_v48 }
  0x53   : > { %542 = vmatpush.bf16.msrb.mxu1 %v1078_v26  ;;  %564 = vmatpush.bf16.msrb.mxu3 %v1096_v29 }
  0x54   : > { %629 = vmatpush.bf16.msrb.mxu2 %v896_v25  ;;  %815 = vmatmul.msk.bf16.gmra.mxu1 %vm393_vm1, %v765_v49 }
  0x56   : > { %608 = vmatpush.bf16.msrb.mxu0 %v1067_v24 }
  0x57   : > { %543 = vmatpush.bf16.msrb.mxu1 %v1090_v28 }
  0x58   : > { %630 = vmatpush.bf16.msrb.mxu2 %v1083_v27 }
  0x59   : > { %417 = vmatmul.bf16.gmra.mxu0 %v761_v54 }
  0x5a   : > { %609 = vmatpush.bf16.msrb.mxu0 %v1078_v26 }
  0x5b   : > { %544 = vmatpush.bf16.msrb.mxu1 %v1110_v35 }
  0x5c   : > { %631 = vmatpush.bf16.msrb.mxu2 %v1096_v29 }
  0x5d   : > { %484 = vmatmul.bf16.gmra.mxu2 %v831_v55 }
  0x5e   : > { %610 = vmatpush.bf16.msrb.mxu0 %v1090_v28 }
  0x5f   : > { %545 = vmatpush.bf16.msrb.mxu1 %v886_v37 }
  0x62   : > { %611 = vmatpush.bf16.msrb.mxu0 %v1110_v35  ;;  %858 = vmatmul.msk.bf16.vlgmr.msrb.gmra.mxu3 %vm393_vm1, %v849_v60 }
  0x64   : > { %546 = vmatmul.bf16.vlgmr.msrb.gmra.mxu1 %v845_v61 }
  0x66   : > { %612 = vmatpush.bf16.msrb.mxu0 %v886_v37 }
  0x69   : > { %613 = vmatmul.bf16.vlgmr.msrb.gmra.mxu0 %v867_v2 }
  0x6d   : > { %880 = vmatmul.msk.bf16.vlgmr.msrb.gmra.mxu2 %vm393_vm1, %v871_v3 }
  0x72   : > { %859 = vmatmul.msk.bf16.gmra.mxu3 %vm393_vm1, %v857_v8 }
  0x74   : > { %551 = vmatmul.bf16.gmra.mxu1 %v853_v9 }
  0x79   : > { %618 = vmatmul.bf16.gmra.mxu0 %v875_v14 }
  0x7d   : > { %881 = vmatmul.msk.bf16.gmra.mxu2 %vm393_vm1, %v879_v15 }
  0xc1   : > { %v432_v16 = vpop.f32.mrf.mxu1 }
  0xc5   : > { %v499_v17 = vpop.f32.mrf.mxu3 }
  0xc6   : > { %v413_v18 = vpop.f32.mrf.mxu0 }
  0xc7   : > { %v433_v35 = vadd.f32 %v432_v16, %v413_v18 }
  0xc9   : > { %v434_v19 = vpop.f32.mrf.mxu1 }
  0xcd   : > { %v501_v21 = vpop.f32.mrf.mxu3 }
  0xce   : > { %v415_v22 = vpop.f32.mrf.mxu0 }
  0xcf   : > { %v435_v50 = vadd.f32 %v434_v19, %v415_v22 }
  0xd0   : > { %v480_v20 = vpop.f32.mrf.mxu2 }
  0xd1   : > { %v437_v23 = vpop.f32.mrf.mxu1  ;;  %v500_v36 = vadd.f32 %v499_v17, %v480_v20 }
  0xd3   : > { %v643_v42 = vmax.f32 %v433_v35, %v500_v36 }
  0xd5   : > { %v504_v25 = vpop.f32.mrf.mxu3 }
  0xd6   : > { %v418_v26 = vpop.f32.mrf.mxu0 }
  0xd7   : > { %v438_v61 = vadd.f32 %v437_v23, %v418_v26 }
  0xd8   : > { %v482_v24 = vpop.f32.mrf.mxu2 }
  0xd9   : > { %v439_v27 = vpop.f32.mrf.mxu1  ;;  %v502_v47 = vadd.f32 %v501_v21, %v482_v24 }
  0xdb   : > { %v644_v54 = vmax.f32 %v435_v50, %v502_v47 }
  0xdd   : > { %v506_v29 = vpop.f32.mrf.mxu3 }
  0xde   : > { %v420_v30 = vpop.f32.mrf.mxu0 }
  0xdf   : > { %v440_v14 = vadd.f32 %v439_v27, %v420_v30 }
  0xe0   : > { %v485_v28 = vpop.f32.mrf.mxu2 }
  0xe1   : > { %v547_v31 = vpop.f32.mrf.mxu1  ;;  %v505_v62 = vadd.f32 %v504_v25, %v485_v28 }
  0xe3   : > { %v645_v4 = vmax.f32 %v438_v61, %v505_v62 }
  0xe5   : > { %v566_v33 = vpop.f32.mrf.mxu3 }
  0xe6   : > { %v614_v34 = vpop.f32.mrf.mxu0  ;;  %v567_v37 = vadd.f32 %v566_v33, %v547_v31 }
  0xe8   : > { %v487_v32 = vpop.f32.mrf.mxu2 }
  0xe9   : > { %v549_v40 = vpop.f32.mrf.mxu1  ;;  %v507_v10 = vadd.f32 %v506_v29, %v487_v32 }
  0xeb   : > { %v646_v18 = vmax.f32 %v440_v14, %v507_v10 }
  0xed   : > { %v568_v41 = vpop.f32.mrf.mxu3 }
  0xee   : > { %v616_v45 = vpop.f32.mrf.mxu0  ;;  %v569_v51 = vadd.f32 %v568_v41, %v549_v40 }
  0xf0   : > { %v633_v38 = vpop.f32.mrf.mxu2 }
  0xf1   : > { %v634_v39 = vadd.f32 %v633_v38, %v614_v34  ;;  %v552_v57 = vpop.f32.mrf.mxu1 }
  0xf3   : > { %v647_v43 = vmax.f32 %v567_v37, %v634_v39 }
  0xf5   : > { %v651_v46 = vmax.f32 %v643_v42, %v647_v43  ;;  %v571_v58 = vpop.f32.mrf.mxu3 }
  0xf6   : > { %v619_v60 = vpop.f32.mrf.mxu0  ;;  %v572_v63 = vadd.f32 %v571_v58, %v552_v57 }
  0xf7   : > { %v659_v48 = vadd.f32 %v938_v44, %v651_v46 }
  0xf8   : > { %v635_v49 = vpop.f32.mrf.mxu2 }
  0xf9   : > { %v663_v52 = vmax.f32 %v659_v48, 0.0  ;;  %v636_v53 = vadd.f32 %v635_v49, %v616_v45  ;;  %v554_v8 = vpop.f32.mrf.mxu1 }
  0xfb   : > { %v667_v55 = vpack.c.bf16 %v663_v52, %v663_v52  ;;  %v648_v56 = vmax.f32 %v569_v51, %v636_v53 }
  0xfd   : > { %672 = vst.msk [vmem:[%s1181_s11] sm:$0xf] %vm671_vm2, %v667_v55  ;;  %v652_v59 = vmax.f32 %v644_v54, %v648_v56  ;;  %v573_v9 = vpop.f32.mrf.mxu3 }
  0xfe   : > { %v621_v12 = vpop.f32.mrf.mxu0  ;;  %v574_v15 = vadd.f32 %v573_v9, %v554_v8 }
  0xff   : > { %v660_v0 = vadd.f32 %v938_v44, %v652_v59 }
 0x100   : > { %v638_v1 = vpop.f32.mrf.mxu2 }
 0x101   : > { %v664_v2 = vmax.f32 %v660_v0, 0.0  ;;  %v639_v3 = vadd.f32 %v638_v1, %v619_v60 }
 0x103   : > { %v668_v5 = vpack.c.bf16 %v664_v2, %v664_v2  ;;  %v649_v6 = vmax.f32 %v572_v63, %v639_v3 }
 0x105   : > { %673 = vst.msk [vmem:[%s1181_s11 + $0x4] sm:$0xf] %vm671_vm2, %v668_v5  ;;  %v653_v7 = vmax.f32 %v645_v4, %v649_v6 }
 0x107   : > { %v661_v11 = vadd.f32 %v938_v44, %v653_v7 }
 0x108   : > { %v640_v13 = vpop.f32.mrf.mxu2 }
 0x109   : > { %v665_v16 = vmax.f32 %v661_v11, 0.0  ;;  %v641_v17 = vadd.f32 %v640_v13, %v621_v12 }
 0x10b   : > { %v669_v19 = vpack.c.bf16 %v665_v16, %v665_v16  ;;  %v650_v20 = vmax.f32 %v574_v15, %v641_v17 }
 0x10d   : > { %674 = vst.msk [vmem:[%s1181_s11 + $0x8] sm:$0xf] %vm671_vm2, %v669_v19  ;;  %v654_v21 = vmax.f32 %v646_v18, %v650_v20 }
 0x10f   : > { %v662_v22 = vadd.f32 %v938_v44, %v654_v21 }
 0x111   : > { %v666_v23 = vmax.f32 %v662_v22, 0.0 }
 0x113   : > { %v670_v24 = vpack.c.bf16 %v666_v23, %v666_v23 }
 0x115   : > { %675 = vst.msk [vmem:[%s1181_s11 + $0xc] sm:$0xf] %vm671_vm2, %v670_v24 }
 0x116 PF: > { %p10_p9 = scmp.ge.s32.totalorder %s1000_s16, 4   ;;  %s1205_s12 = smov %s957_s13 }
 0x117   : > { %s1206_s13 = smov %s1009_s19  ;;  %s1207_s14 = smov %s1000_s16 }
 0x118   :  { %12 = sbr.rel (!%p10_p9) target bundleno = 2 (0x2), region = 108 }

// kernel: net_forward.5
= control target key start
LH: loop header
LB: loop body
LE: loop exit
PB: predicated region body
PF: predicated region fallthrough
CT: control target
= control target key end

     0   :  { %s1049_s24 = smov 0   ;;  %s1206_s0 = inlined_call_operand.vmem [shape: bf16[16,400], index: 0, kind: input, shape index: {}]   ;;  %s1207_s1 = inlined_call_operand.vmem [shape: bf16[400,128], index: 1, kind: input, shape index: {}]   ;;  %s1208_s2 = inlined_call_operand.vmem [shape: f32[1,128], index: 2, kind: input, shape index: {}]   ;;  %s1209_s3 = inlined_call_operand.vmem [shape: bf16[128,128], index: 3, kind: input, shape index: {}]   ;;  %s1210_s4 = inlined_call_operand.vmem [shape: f32[1,128], index: 4, kind: input, shape index: {}]   ;;  %s1211_s5 = inlined_call_operand.vmem [shape: bf16[128,128], index: 5, kind: input, shape index: {}]   ;;  %s1212_s6 = inlined_call_operand.vmem [shape: f32[1,128], index: 6, kind: input, shape index: {}]   ;;  %s1213_s7 = inlined_call_operand.vmem [shape: f32[16,128], index: 7, kind: output, shape index: {}]  }
   0x1 LB: > { %s773_s25 = sadd.s32 4294967295, %s1007_s24   ;;  %p777_p0 = scmp.ge.s32.totalorder %s1007_s24, 1  ;;  %s1007_s24 = sphi %s1049_s24, %s17_s24  }
   0x2   : > { %p237_p1 = scmp.lt.s32.totalorder %s1007_s24, 3 }
   0x4   : > { %p238_p2 = pnand %p777_p0, %p237_p1 }
   0x5   : > { %p268_p3 = scmp.lt.s32.totalorder (!%p238_p2), %s773_s25, 1 }
   0x6   : > { %241 = sbr.rel (%p238_p2) target bundleno = 457 (0x1c9), region = 48 }
   0xb   : > { %v956_v0 = vld [vmem:[%s1207_s1 + $0x38] sm:$0xff]  ;;  %v955_v3 = vld [vmem:[%s1207_s1 + $0x30] sm:$0xff]  ;;  %s1215_s25 = smov (!%p268_p3, %s773_s25), 1  ;;  %v954_v6 = vld [vmem:[%s1207_s1 + $0x28] sm:$0xff]  ;;  %vm497_vm0 = vcmask 130048  }
   0xc   : > { %v964_v1 = vld [vmem:[%s1207_s1 + $0x78] sm:$0xff]  ;;  %501 = vmatpush.bf16.msra.mxu0 %v956_v0  ;;  %v963_v4 = vld [vmem:[%s1207_s1 + $0x70] sm:$0xff]  ;;  %s948_s15 = sshll.u32 %s1215_s25, 4  ;;  %v962_v7 = vld [vmem:[%s1207_s1 + $0x68] sm:$0xff]  ;;  %s780_s10 = sshll.u32 %s1215_s25, 3 }
   0xd   : > { %v972_v2 = vld [vmem:[%s1207_s1 + $0xb8] sm:$0xff]  ;;  %514 = vmatpush.bf16.msra.mxu1 %v964_v1  ;;  %v971_v5 = vld [vmem:[%s1207_s1 + $0xb0] sm:$0xff]  ;;  %s1081_s18 = scalar_lea.vmem %s1206_s0, %s948_s15  ;;  %v973_v8 = vld [vmem:[%s1207_s1 + $0xc0] sm:$0xff]  ;;  %s276_s15 = scalar_lea.vmem %s1213_s7, %s780_s10 }
   0xe   : > { %527 = vmatpush.bf16.msra.mxu2 %v972_v2  ;;  %v970_v9 = vld [vmem:[%s1207_s1 + $0xa8] sm:$0xff]  ;;  %547 = vmatpush.bf16.msra.mxu3 %v973_v8  ;;  %v953_v12 = vld [vmem:[%s1207_s1 + $0x20] sm:$0xff]  ;;  %v981_v13 = vld [vmem:[%s1209_s3 + $0x38] sm:$0xff] }
   0xf   : > { %v279_v10 = vld [vmem:[%s1081_s18 + $0x8] sm:$0xff]  ;;  %v961_v14 = vld [vmem:[%s1207_s1 + $0x60] sm:$0xff]  ;;  %v980_v17 = vld [vmem:[%s1209_s3 + $0x30] sm:$0xff] }
  0x10   : > { %502 = vmatpush.bf16.msra.mxu0 %v955_v3  ;;  %v339_v11 = vunpack.c.h.b16 %v279_v10  ;;  %v969_v15 = vld [vmem:[%s1207_s1 + $0xa0] sm:$0xff]  ;;  %v952_v18 = vld [vmem:[%s1207_s1 + $0x18] sm:$0xff]  ;;  %v979_v21 = vld [vmem:[%s1209_s3 + $0x28] sm:$0xff]  ;;  %v338_v34 = vunpack.c.l.b16 %v279_v10 }
  0x11   : > { %515 = vmatpush.bf16.msra.mxu1 %v963_v4  ;;  %v960_v19 = vld [vmem:[%s1207_s1 + $0x58] sm:$0xff]  ;;  %v951_v22 = vld [vmem:[%s1207_s1 + $0x10] sm:$0xff]  ;;  %v978_v25 = vld [vmem:[%s1209_s3 + $0x20] sm:$0xff] }
  0x12   : > { %528 = vmatpush.bf16.msra.mxu2 %v971_v5  ;;  %v343_v16 = vpack.c.b16 %v339_v11, %v339_v11  ;;  %623 = vmatpush.bf16.msrb.mxu3 %v981_v13  ;;  %v968_v20 = vld [vmem:[%s1207_s1 + $0x98] sm:$0xff]  ;;  %v959_v23 = vld [vmem:[%s1207_s1 + $0x50] sm:$0xff]  ;;  %v950_v26 = vld [vmem:[%s1207_s1 + $0x8] sm:$0xff]  ;;  %v342_v38 = vpack.c.b16 %v338_v34, %v338_v34 }
  0x13   : > { %v967_v24 = vld [vmem:[%s1207_s1 + $0x90] sm:$0xff]  ;;  %v958_v27 = vld [vmem:[%s1207_s1 + $0x48] sm:$0xff]  ;;  %v278_v28 = vld [vmem:[%s1081_s18] sm:$0xff] }
  0x14   : > { %503 = vmatpush.bf16.msra.mxu0 %v954_v6  ;;  %881 = vmatmul.msk.bf16.vlgmr.msra.gmra.mxu3 %vm497_vm0, %v343_v16  ;;  %v966_v29 = vld [vmem:[%s1207_s1 + $0x88] sm:$0xff]  ;;  %v336_v30 = vunpack.c.l.b16 %v278_v28  ;;  %v337_v31 = vunpack.c.h.b16 %v278_v28  ;;  %v949_v32 = vld [vmem:[%s1207_s1] sm:$0xff]  ;;  %v977_v39 = vld [vmem:[%s1209_s3 + $0x18] sm:$0xff] }
  0x15   : > { %516 = vmatpush.bf16.msra.mxu1 %v962_v7  ;;  %v957_v33 = vld [vmem:[%s1207_s1 + $0x40] sm:$0xff]  ;;  %v976_v40 = vld [vmem:[%s1209_s3 + $0x10] sm:$0xff]  ;;  %v975_v41 = vld [vmem:[%s1209_s3 + $0x8] sm:$0xff] }
  0x16   : > { %529 = vmatpush.bf16.msra.mxu2 %v970_v9  ;;  %624 = vmatpush.bf16.msrb.mxu3 %v980_v17  ;;  %v965_v35 = vld [vmem:[%s1207_s1 + $0x80] sm:$0xff]  ;;  %v340_v36 = vpack.c.b16 %v336_v30, %v336_v30  ;;  %v341_v37 = vpack.c.b16 %v337_v31, %v337_v31  ;;  %v989_v43 = vld [vmem:[%s1211_s5 + $0x38] sm:$0xff]  ;;  %v988_v45 = vld [vmem:[%s1211_s5 + $0x30] sm:$0xff] }
  0x17   : > { %v974_v42 = vld [vmem:[%s1209_s3] sm:$0xff]  ;;  %v987_v46 = vld [vmem:[%s1211_s5 + $0x28] sm:$0xff]  ;;  %v985_v50 = vld [vmem:[%s1211_s5 + $0x18] sm:$0xff] }
  0x18   : > { %504 = vmatpush.bf16.msra.mxu0 %v953_v12  ;;  %v986_v48 = vld [vmem:[%s1211_s5 + $0x20] sm:$0xff]  ;;  %v984_v54 = vld [vmem:[%s1211_s5 + $0x10] sm:$0xff]  ;;  %v983_v0 = vld [vmem:[%s1211_s5 + $0x8] sm:$0xff] }
  0x19   : > { %517 = vmatpush.bf16.msra.mxu1 %v961_v14  ;;  %v998_v49 = vld [vmem:[%s1208_s2] ss:$0 sm:$0xff] }
  0x1a   : > { %530 = vmatpush.bf16.msra.mxu2 %v969_v15  ;;  %625 = vmatpush.bf16.msrb.mxu3 %v979_v21  ;;  %v982_v1 = vld [vmem:[%s1211_s5] sm:$0xff] }
  0x1b   : > { %v999_v2 = vld [vmem:[%s1210_s4] ss:$0 sm:$0xff] }
  0x1c   : > { %505 = vmatpush.bf16.msra.mxu0 %v952_v18  ;;  %v1000_v8 = vld [vmem:[%s1212_s6] ss:$0 sm:$0xff] }
  0x1d   : > { %518 = vmatpush.bf16.msra.mxu1 %v960_v19 }
  0x1e   : > { %531 = vmatpush.bf16.msra.mxu2 %v968_v20  ;;  %626 = vmatpush.bf16.msrb.mxu3 %v978_v25 }
  0x20   : > { %506 = vmatpush.bf16.msra.mxu0 %v951_v22 }
  0x21   : > { %519 = vmatpush.bf16.msra.mxu1 %v959_v23 }
  0x22   : > { %532 = vmatpush.bf16.msra.mxu2 %v967_v24  ;;  %627 = vmatpush.bf16.msrb.mxu3 %v977_v39 }
  0x24   : > { %507 = vmatpush.bf16.msra.mxu0 %v950_v26 }
  0x25   : > { %520 = vmatpush.bf16.msra.mxu1 %v958_v27 }
  0x26   : > { %533 = vmatpush.bf16.msra.mxu2 %v966_v29  ;;  %628 = vmatpush.bf16.msrb.mxu3 %v976_v40 }
  0x28   : > { %508 = vmatpush.bf16.msra.mxu0 %v949_v32 }
  0x29   : > { %521 = vmatpush.bf16.msra.mxu1 %v957_v33 }
  0x2a   : > { %534 = vmatpush.bf16.msra.mxu2 %v965_v35  ;;  %629 = vmatpush.bf16.msrb.mxu3 %v975_v41 }
  0x2b   : > { %509 = vmatmul.bf16.vlgmr.msra.gmra.mxu0 %v340_v36 }
  0x2c   : > { %522 = vmatmul.bf16.vlgmr.msra.gmra.mxu1 %v341_v37  ;;  %706 = vmatpush.bf16.msrb.mxu0 %v989_v43 }
  0x2d   : > { %535 = vmatmul.bf16.vlgmr.msra.gmra.mxu2 %v342_v38 }
  0x2e   : > { %630 = vmatpush.bf16.msrb.mxu3 %v974_v42 }
  0x30   : > { %707 = vmatpush.bf16.msrb.mxu0 %v988_v45 }
  0x34   : > { %708 = vmatpush.bf16.msrb.mxu0 %v987_v46 }
  0x38   : > { %709 = vmatpush.bf16.msrb.mxu0 %v986_v48 }
  0x3c   : > { %710 = vmatpush.bf16.msrb.mxu0 %v985_v50 }
  0x40   : > { %711 = vmatpush.bf16.msrb.mxu0 %v984_v54 }
  0x44   : > { %712 = vmatpush.bf16.msrb.mxu0 %v983_v0 }
  0x48   : > { %713 = vmatpush.bf16.msrb.mxu0 %v982_v1 }
  0x97   : > { %v549_v44 = vpop.f32.mrf.mxu3 }
  0x9f   : > { %v551_v47 = vpop.f32.mrf.mxu3 }
  0xa8   : > { %v510_v51 = vpop.f32.mrf.mxu0 }
  0xa9   : > { %v523_v52 = vpop.f32.mrf.mxu1  ;;  %v511_v53 = vadd.f32 %v998_v49, %v510_v51 }
  0xab   : > { %v524_v55 = vadd.f32 %v523_v52, %v511_v53 }
  0xb0   : > { %v536_v56 = vpop.f32.mrf.mxu2  ;;  %v512_v58 = vpop.f32.mrf.mxu0 }
  0xb1   : > { %v537_v57 = vadd.f32 %v536_v56, %v524_v55  ;;  %v525_v59 = vpop.f32.mrf.mxu1 }
  0xb3   : > { %v550_v60 = vadd.f32 %v549_v44, %v537_v57 }
  0xb5   : > { %v553_v61 = vmax.f32 %v550_v60, 0.0 }
  0xb7   : > { %v554_v62 = vpack.c.bf16 %v553_v61, %v553_v61 }
  0xb8   : > { %v538_v63 = vpop.f32.mrf.mxu2 }
  0xb9   : > { %631 = vmatmul.bf16.vlgmr.msrb.gmra.mxu3 %v554_v62 }
 0x13c   : > { %v632_v3 = vpop.f32.mrf.mxu3 }
 0x13d   : > { %v633_v4 = vadd.f32 %v999_v2, %v632_v3 }
 0x13f   : > { %v636_v5 = vmax.f32 %v633_v4, 0.0 }
 0x141   : > { %v637_v6 = vpack.c.bf16 %v636_v5, %v636_v5 }
 0x143   : > { %714 = vmatmul.bf16.vlgmr.msrb.gmra.mxu0 %v637_v6 }
 0x144   : > { %v634_v7 = vpop.f32.mrf.mxu3 }
 0x1c0   : > { %v715_v9 = vpop.f32.mrf.mxu0 }
 0x1c1   : > { %v716_v10 = vadd.f32 %v1000_v8, %v715_v9 }
 0x1c3   : > { %719 = vst [vmem:[%s276_s15] sm:$0xff] %v716_v10 }
 0x1c8   : > { %v717_v11 = vpop.f32.mrf.mxu0 }
 0x1c9 PF: > { %s17_s24 = sadd.s32 1, %s1007_s24  }
 0x1ca   : > { %p14_p4 = scmp.ge.s32.totalorder %s17_s24, 4  }
 0x1cc   :  { %16 = sbr.rel (!%p14_p4) target bundleno = 1 (0x1), region = 78 }

</bundles_post_ra>
